<compile_context>
chip_gen: v5e
topology: v5e:2x2
jax: 0.10.0
libtpu: 0.0.40
codegen_flags: <defaults>
</compile_context>

<pallas_src>
import jax
import jax.numpy as jnp
from jax import lax
from jax.experimental import pallas as pl
from jax.experimental.pallas import tpu as pltpu


def _round_up(x, m):
    return ((x + m - 1) // m) * m


# ----------------------------- Pallas kernel -------------------------------- #
def rnn_wavefront_kernel(tok_ref, emb_ref, wih0_ref, b_ref, wstack_ref,
                         wcls_ref, bcls_ref, out_ref):
    # tok_ref   : (S*Bp, 1) int32   time-major padded token ids
    # emb_ref   : (Vp, Hp)   f32    zero-padded embedding table (row 0 = pad)
    # wih0_ref  : (Hp, Hp)   f32    layer-0 input->hidden weight, (in,out)
    # b_ref     : (L, 1, Hp) f32    combined per-layer bias (b_ih + b_hh)
    # wstack_ref: (L*Hp,L*Hp)f32    block matrix: diag=Whh_l, superdiag=Wih_{l+1}
    # wcls_ref  : (Hp, Cp)   f32    classifier weight, (in,out)
    # bcls_ref  : (1, Cp)    f32    classifier bias
    # out_ref   : (Bp, Cp)   f32    lane-dense padded logits
    SB = tok_ref.shape[0]
    Vp, Hp = emb_ref.shape
    LH = wstack_ref.shape[0]
    L = LH // Hp
    Bp = out_ref.shape[0]
    S = SB // Bp
    W = S + L - 1                                   # number of wavefronts

    # ---- Embedding gather fused in-kernel as a one-hot MXU matmul ----------
    # (only appropriate while Vp is small; see DMA-gather TODO above)
    vocab_ids = lax.broadcasted_iota(jnp.int32, (SB, Vp), 1)
    one_hot = (tok_ref[...] == vocab_ids).astype(jnp.float32)     # (S*Bp, Vp)
    x = jnp.dot(one_hot, emb_ref[...],
                preferred_element_type=jnp.float32)               # (S*Bp, Hp)

    # ---- Layer-0 input projection for ALL timesteps in ONE GEMM ------------
    proj0 = (jnp.dot(x, wih0_ref[...], preferred_element_type=jnp.float32)
             + b_ref[0])                                          # (S*Bp, Hp)

    # hoist small per-layer bias loads (l >= 1 used inside the loop)
    biases = [b_ref[l] for l in range(L)]                         # each (1, Hp)

    # ---- Diagonal wavefront recurrence: S+L-1 dependent steps --------------
    # state = [h_0 | h_1 | ... | h_{L-1}], lane-blocked; at start of wavefront
    # w, block l holds h_l[w-1-l] (0 for negative time).  One (Bp,L*Hp) x
    # (L*Hp,L*Hp) MXU dot per wavefront updates all layers at once.
    state = jnp.zeros((Bp, LH), jnp.float32)
    pooled = None
    top = (L - 1) * Hp

    for w in range(W):                              # static, fully unrolled
        pre = jnp.dot(state, wstack_ref[...],       # weight streamed from VMEM
                      preferred_element_type=jnp.float32)         # (Bp, L*Hp)
        blocks = []
        for l in range(L):
            t = w - l
            blk = pre[:, l * Hp:(l + 1) * Hp]       # 128-lane-aligned slice
            if 0 <= t < S:                          # layer l active this wave
                if l == 0:
                    blk = blk + proj0[t * Bp:(t + 1) * Bp, :]
                else:
                    blk = blk + biases[l]
            # inactive layers: no bias -> tanh(0)=0 keeps cold state exactly 0;
            # past-the-end layers produce values that are never consumed.
            blocks.append(blk)
        state = jnp.tanh(jnp.concatenate(blocks, axis=1))
        if w >= L - 1:                              # top layer emits h_{L-1}[w-L+1]
            h_top = state[:, top:top + Hp]
            pooled = h_top if w == L - 1 else jnp.maximum(pooled, h_top)

    # ---- Final linear classifier; lane-dense (Bp, Cp) store -----------------
    out_ref[...] = (jnp.dot(pooled, wcls_ref[...],
                            preferred_element_type=jnp.float32)
                    + bcls_ref[...])


# ------------------------------- wrapper ------------------------------------ #
def torch_model_forward(tokens, kernel_params, class_num):
    emb_p, wih0_p, b_p, wstack_p, wcls_p, bcls_p = kernel_params
    B, S = tokens.shape
    Bp = _round_up(max(B, 8), 8)
    Vp, Hp = emb_p.shape
    LH = wstack_p.shape[0]
    L = LH // Hp
    Cp = wcls_p.shape[1]

    # Pad batch with padding-token rows (id 0 -> zero embedding), go
    # time-major, flatten for the kernel's one-hot gather.  Tiny int ops that
    # fuse with the custom call under jit.
    tok_p = jnp.zeros((Bp, S), jnp.int32).at[:B, :].set(tokens.astype(jnp.int32))
    tok_flat = jnp.transpose(tok_p, (1, 0)).reshape(S * Bp, 1)

    SB = S * Bp
    W = S + L - 1
    flops = 2 * (SB * Vp * Hp + SB * Hp * Hp + W * Bp * LH * LH + Bp * Hp * Cp)
    bytes_accessed = 4 * (SB + Vp * Hp + Hp * Hp + L * Hp + LH * LH
                          + Hp * Cp + Cp + Bp * Cp)

    vmem = pl.BlockSpec(memory_space=pltpu.MemorySpace.VMEM)
    out_padded = pl.pallas_call(
        rnn_wavefront_kernel,
        out_shape=jax.ShapeDtypeStruct((Bp, Cp), jnp.float32),
        in_specs=[vmem] * 7,
        out_specs=vmem,
        cost_estimate=pl.CostEstimate(flops=flops,
                                      transcendentals=W * Bp * LH,
                                      bytes_accessed=bytes_accessed),
    )(tok_flat, emb_p, wih0_p, b_p, wstack_p, wcls_p, bcls_p)
    return out_padded[:B, :class_num]


# ------------------------- deterministic parameters -------------------------- #
def init_raw_params(key, vocab_size, hidden_size, class_num, num_layers):
    """PyTorch-layout parameters (used directly by the pure-JAX reference)."""
    ks = jax.random.split(key, 6)
    emb = 0.1 * jax.random.normal(ks[0], (vocab_size, hidden_size), jnp.float32)
    emb = emb.at[0].set(0.0)                                    # padding_idx=0
    w_ih = 0.1 * jax.random.normal(ks[1], (num_layers, hidden_size, hidden_size),
                                   jnp.float32)
    w_hh = 0.1 * jax.random.normal(ks[2], (num_layers, hidden_size, hidden_size),
                                   jnp.float32)
    b_ih = 0.1 * jax.random.normal(ks[3], (num_layers, hidden_size), jnp.float32)
    b_hh = 0.1 * jax.random.normal(ks[4], (num_layers, hidden_size), jnp.float32)
    w_cls = 0.1 * jax.random.normal(ks[5], (class_num, hidden_size), jnp.float32)
    b_cls = jnp.zeros((class_num,), jnp.float32)
    return emb, w_ih, w_hh, b_ih, b_hh, w_cls, b_cls


def prepare_kernel_params(raw):
    """Pre-transpose to (in,out), combine biases, build the block-diagonal
    stacked recurrent weight, and zero-pad to (8,128) tiles.

    INVARIANT (required for correctness): all padded lanes/rows of every
    weight and bias are exactly zero, so padded hidden lanes remain exactly
    0 through tanh, the max-pool, and the classifier.  All arrays below are
    built from jnp.zeros + .at[].set, which guarantees this by construction.
    """
    emb, w_ih, w_hh, b_ih, b_hh, w_cls, b_cls = raw
    V, H = emb.shape
    L = w_ih.shape[0]
    C = w_cls.shape[0]
    Vp = _round_up(V, 128)
    Hp = _round_up(H, 128)
    Cp = _round_up(C, 128)

    emb_p = jnp.zeros((Vp, Hp), jnp.float32).at[:V, :H].set(emb)
    wih0_p = jnp.zeros((Hp, Hp), jnp.float32).at[:H, :H].set(w_ih[0].T)
    b_p = jnp.zeros((L, 1, Hp), jnp.float32).at[:, 0, :H].set(b_ih + b_hh)

    # Stacked wavefront weight: block (l,l) = Whh_l^T, block (l,l+1) = Wih_{l+1}^T.
    wstack_p = jnp.zeros((L * Hp, L * Hp), jnp.float32)
    for l in range(L):
        wstack_p = wstack_p.at[l * Hp:l * Hp + H, l * Hp:l * Hp + H].set(w_hh[l].T)
        if l + 1 < L:
            wstack_p = wstack_p.at[l * Hp:l * Hp + H,
                                   (l + 1) * Hp:(l + 1) * Hp + H].set(w_ih[l + 1].T)

    wcls_p = jnp.zeros((Hp, Cp), jnp.float32).at[:H, :C].set(w_cls.T)
    bcls_p = jnp.zeros((1, Cp), jnp.float32).at[0, :C].set(b_cls)
    return emb_p, wih0_p, b_p, wstack_p, wcls_p, bcls_p


# --------------------------- pure-JAX reference ------------------------------ #
def reference_forward(tokens, raw):
    emb, w_ih, w_hh, b_ih, b_hh, w_cls, b_cls = raw
    x = jnp.take(emb, tokens, axis=0)                      # (B, S, H)
    B, S, H = x.shape
    L = w_ih.shape[0]
    hs = [jnp.zeros((B, H), jnp.float32) for _ in range(L)]
    outs = []
    for t in range(S):
        inp = x[:, t, :]
        for l in range(L):
            hs[l] = jnp.tanh(inp @ w_ih[l].T + hs[l] @ w_hh[l].T
                             + b_ih[l] + b_hh[l])
            inp = hs[l]
        outs.append(inp)
    pooled = jnp.stack(outs, axis=1).max(axis=1)           # max pool over seq
    return pooled @ w_cls.T + b_cls


# ---------------------------------- main ------------------------------------- #
if __name__ == "__main__":
    config = dict(hidden_size=32, vocab_size=30, class_num=5,
                  model_type="rnn", num_layers=2, pooling_style="max")
    B, S = 2, 8

    key = jax.random.PRNGKey(0)
    k_tok, k_param = jax.random.split(key)
    tokens = jax.random.randint(k_tok, (B, S), 0, config["vocab_size"],
                                dtype=jnp.int32)
    raw = init_raw_params(k_param, config["vocab_size"], config["hidden_size"],
                          config["class_num"], config["num_layers"])
    kparams = prepare_kernel_params(raw)

    forward = jax.jit(torch_model_forward, static_argnums=(2,))
    logits = forward(tokens, kparams, config["class_num"])
    logits = jax.block_until_ready(logits)

    ref = reference_forward(tokens, raw)
    assert logits.shape == (B, config["class_num"])
    assert jnp.allclose(logits, ref, atol=1e-4, rtol=1e-4), \
        f"mismatch: {logits} vs {ref}"

    print("KERNEL_OK")
</pallas_src>

<mosaic_0001>
module attributes {stable_mosaic.version = 11 : i64} {
  func.func @rnn_wavefront_kernel(%arg0: memref<64x1xi32, #tpu.memory_space<vmem>>, %arg1: memref<128x128xf32, #tpu.memory_space<vmem>>, %arg2: memref<128x128xf32, #tpu.memory_space<vmem>>, %arg3: memref<2x1x128xf32, #tpu.memory_space<vmem>>, %arg4: memref<256x256xf32, #tpu.memory_space<vmem>>, %arg5: memref<128x128xf32, #tpu.memory_space<vmem>>, %arg6: memref<1x128xf32, #tpu.memory_space<vmem>>, %arg7: memref<8x128xf32, #tpu.memory_space<vmem>>) attributes {dimension_semantics = [], scalar_prefetch = 0 : i64, scratch_operands = 0 : i64, tpu.core_type = #tpu.core_type<tc>} {
    %0 = tpu.iota {dimensions = array<i32: 1>} : vector<64x128xi32>
    %c0 = arith.constant 0 : index
    %c0_0 = arith.constant 0 : index
    %1 = vector.load %arg0[%c0, %c0_0] : memref<64x1xi32, #tpu.memory_space<vmem>>, vector<64x1xi32>
    %2 = vector.broadcast %1 : vector<64x1xi32> to vector<64x128xi32>
    %3 = arith.cmpi eq, %2, %0 : vector<64x128xi32>
    %4 = arith.extui %3 : vector<64x128xi1> to vector<64x128xi32>
    %5 = arith.sitofp %4 : vector<64x128xi32> to vector<64x128xf32>
    %c0_1 = arith.constant 0 : index
    %c0_2 = arith.constant 0 : index
    %6 = vector.load %arg1[%c0_1, %c0_2] : memref<128x128xf32, #tpu.memory_space<vmem>>, vector<128x128xf32>
    %cst = arith.constant dense<0.000000e+00> : vector<64x128xf32>
    %7 = tpu.matmul %5, %6, %cst {dimension_numbers = #tpu.dot_dimension_numbers<[1], [0], [0], [1], [0, 0, 1, 1], [], []>} : vector<64x128xf32>, vector<128x128xf32>, vector<64x128xf32> -> vector<64x128xf32>
    %c0_3 = arith.constant 0 : index
    %c0_4 = arith.constant 0 : index
    %8 = vector.load %arg2[%c0_3, %c0_4] : memref<128x128xf32, #tpu.memory_space<vmem>>, vector<128x128xf32>
    %cst_5 = arith.constant dense<0.000000e+00> : vector<64x128xf32>
    %9 = tpu.matmul %7, %8, %cst_5 {dimension_numbers = #tpu.dot_dimension_numbers<[1], [0], [0], [1], [0, 0, 1, 1], [], []>} : vector<64x128xf32>, vector<128x128xf32>, vector<64x128xf32> -> vector<64x128xf32>
    %c0_6 = arith.constant 0 : index
    %c0_7 = arith.constant 0 : index
    %c0_8 = arith.constant 0 : index
    %10 = vector.load %arg3[%c0_6, %c0_7, %c0_8] : memref<2x1x128xf32, #tpu.memory_space<vmem>>, vector<1x1x128xf32>
    %11 = vector.shape_cast %10 : vector<1x1x128xf32> to vector<1x128xf32>
    %12 = vector.broadcast %11 : vector<1x128xf32> to vector<64x128xf32>
    %13 = arith.addf %9, %12 : vector<64x128xf32>
    %c1 = arith.constant 1 : index
    %c0_9 = arith.constant 0 : index
    %c0_10 = arith.constant 0 : index
    %14 = vector.load %arg3[%c1, %c0_9, %c0_10] : memref<2x1x128xf32, #tpu.memory_space<vmem>>, vector<1x1x128xf32>
    %15 = vector.shape_cast %14 : vector<1x1x128xf32> to vector<1x128xf32>
    %cst_11 = arith.constant 0.000000e+00 : f32
    %16 = vector.broadcast %cst_11 : f32 to vector<8x256xf32>
    %c0_12 = arith.constant 0 : index
    %c0_13 = arith.constant 0 : index
    %17 = vector.load %arg4[%c0_12, %c0_13] : memref<256x256xf32, #tpu.memory_space<vmem>>, vector<256x256xf32>
    %cst_14 = arith.constant dense<0.000000e+00> : vector<8x256xf32>
    %18 = tpu.matmul %16, %17, %cst_14 {dimension_numbers = #tpu.dot_dimension_numbers<[1], [0], [0], [1], [0, 0, 1, 1], [], []>} : vector<8x256xf32>, vector<256x256xf32>, vector<8x256xf32> -> vector<8x256xf32>
    %19 = vector.extract_strided_slice %18 {offsets = [0, 0], sizes = [8, 128], strides = [1, 1]} : vector<8x256xf32> to vector<8x128xf32>
    %20 = vector.extract_strided_slice %13 {offsets = [0, 0], sizes = [8, 128], strides = [1, 1]} : vector<64x128xf32> to vector<8x128xf32>
    %21 = arith.addf %19, %20 : vector<8x128xf32>
    %22 = vector.extract_strided_slice %18 {offsets = [0, 128], sizes = [8, 128], strides = [1, 1]} : vector<8x256xf32> to vector<8x128xf32>
    %23 = tpu.concatenate %21, %22 in 1 : vector<8x128xf32>, vector<8x128xf32> -> vector<8x256xf32>
    %24 = math.tanh %23 : vector<8x256xf32>
    %c0_15 = arith.constant 0 : index
    %c0_16 = arith.constant 0 : index
    %25 = vector.load %arg4[%c0_15, %c0_16] : memref<256x256xf32, #tpu.memory_space<vmem>>, vector<256x256xf32>
    %cst_17 = arith.constant dense<0.000000e+00> : vector<8x256xf32>
    %26 = tpu.matmul %24, %25, %cst_17 {dimension_numbers = #tpu.dot_dimension_numbers<[1], [0], [0], [1], [0, 0, 1, 1], [], []>} : vector<8x256xf32>, vector<256x256xf32>, vector<8x256xf32> -> vector<8x256xf32>
    %27 = vector.extract_strided_slice %26 {offsets = [0, 0], sizes = [8, 128], strides = [1, 1]} : vector<8x256xf32> to vector<8x128xf32>
    %28 = vector.extract_strided_slice %13 {offsets = [8, 0], sizes = [8, 128], strides = [1, 1]} : vector<64x128xf32> to vector<8x128xf32>
    %29 = arith.addf %27, %28 : vector<8x128xf32>
    %30 = vector.extract_strided_slice %26 {offsets = [0, 128], sizes = [8, 128], strides = [1, 1]} : vector<8x256xf32> to vector<8x128xf32>
    %31 = vector.broadcast %15 : vector<1x128xf32> to vector<8x128xf32>
    %32 = arith.addf %30, %31 : vector<8x128xf32>
    %33 = tpu.concatenate %29, %32 in 1 : vector<8x128xf32>, vector<8x128xf32> -> vector<8x256xf32>
    %34 = math.tanh %33 : vector<8x256xf32>
    %35 = vector.extract_strided_slice %34 {offsets = [0, 128], sizes = [8, 128], strides = [1, 1]} : vector<8x256xf32> to vector<8x128xf32>
    %c0_18 = arith.constant 0 : index
    %c0_19 = arith.constant 0 : index
    %36 = vector.load %arg4[%c0_18, %c0_19] : memref<256x256xf32, #tpu.memory_space<vmem>>, vector<256x256xf32>
    %cst_20 = arith.constant dense<0.000000e+00> : vector<8x256xf32>
    %37 = tpu.matmul %34, %36, %cst_20 {dimension_numbers = #tpu.dot_dimension_numbers<[1], [0], [0], [1], [0, 0, 1, 1], [], []>} : vector<8x256xf32>, vector<256x256xf32>, vector<8x256xf32> -> vector<8x256xf32>
    %38 = vector.extract_strided_slice %37 {offsets = [0, 0], sizes = [8, 128], strides = [1, 1]} : vector<8x256xf32> to vector<8x128xf32>
    %39 = vector.extract_strided_slice %13 {offsets = [16, 0], sizes = [8, 128], strides = [1, 1]} : vector<64x128xf32> to vector<8x128xf32>
    %40 = arith.addf %38, %39 : vector<8x128xf32>
    %41 = vector.extract_strided_slice %37 {offsets = [0, 128], sizes = [8, 128], strides = [1, 1]} : vector<8x256xf32> to vector<8x128xf32>
    %42 = vector.broadcast %15 : vector<1x128xf32> to vector<8x128xf32>
    %43 = arith.addf %41, %42 : vector<8x128xf32>
    %44 = tpu.concatenate %40, %43 in 1 : vector<8x128xf32>, vector<8x128xf32> -> vector<8x256xf32>
    %45 = math.tanh %44 : vector<8x256xf32>
    %46 = vector.extract_strided_slice %45 {offsets = [0, 128], sizes = [8, 128], strides = [1, 1]} : vector<8x256xf32> to vector<8x128xf32>
    %47 = arith.maximumf %35, %46 : vector<8x128xf32>
    %c0_21 = arith.constant 0 : index
    %c0_22 = arith.constant 0 : index
    %48 = vector.load %arg4[%c0_21, %c0_22] : memref<256x256xf32, #tpu.memory_space<vmem>>, vector<256x256xf32>
    %cst_23 = arith.constant dense<0.000000e+00> : vector<8x256xf32>
    %49 = tpu.matmul %45, %48, %cst_23 {dimension_numbers = #tpu.dot_dimension_numbers<[1], [0], [0], [1], [0, 0, 1, 1], [], []>} : vector<8x256xf32>, vector<256x256xf32>, vector<8x256xf32> -> vector<8x256xf32>
    %50 = vector.extract_strided_slice %49 {offsets = [0, 0], sizes = [8, 128], strides = [1, 1]} : vector<8x256xf32> to vector<8x128xf32>
    %51 = vector.extract_strided_slice %13 {offsets = [24, 0], sizes = [8, 128], strides = [1, 1]} : vector<64x128xf32> to vector<8x128xf32>
    %52 = arith.addf %50, %51 : vector<8x128xf32>
    %53 = vector.extract_strided_slice %49 {offsets = [0, 128], sizes = [8, 128], strides = [1, 1]} : vector<8x256xf32> to vector<8x128xf32>
    %54 = vector.broadcast %15 : vector<1x128xf32> to vector<8x128xf32>
    %55 = arith.addf %53, %54 : vector<8x128xf32>
    %56 = tpu.concatenate %52, %55 in 1 : vector<8x128xf32>, vector<8x128xf32> -> vector<8x256xf32>
    %57 = math.tanh %56 : vector<8x256xf32>
    %58 = vector.extract_strided_slice %57 {offsets = [0, 128], sizes = [8, 128], strides = [1, 1]} : vector<8x256xf32> to vector<8x128xf32>
    %59 = arith.maximumf %47, %58 : vector<8x128xf32>
    %c0_24 = arith.constant 0 : index
    %c0_25 = arith.constant 0 : index
    %60 = vector.load %arg4[%c0_24, %c0_25] : memref<256x256xf32, #tpu.memory_space<vmem>>, vector<256x256xf32>
    %cst_26 = arith.constant dense<0.000000e+00> : vector<8x256xf32>
    %61 = tpu.matmul %57, %60, %cst_26 {dimension_numbers = #tpu.dot_dimension_numbers<[1], [0], [0], [1], [0, 0, 1, 1], [], []>} : vector<8x256xf32>, vector<256x256xf32>, vector<8x256xf32> -> vector<8x256xf32>
    %62 = vector.extract_strided_slice %61 {offsets = [0, 0], sizes = [8, 128], strides = [1, 1]} : vector<8x256xf32> to vector<8x128xf32>
    %63 = vector.extract_strided_slice %13 {offsets = [32, 0], sizes = [8, 128], strides = [1, 1]} : vector<64x128xf32> to vector<8x128xf32>
    %64 = arith.addf %62, %63 : vector<8x128xf32>
    %65 = vector.extract_strided_slice %61 {offsets = [0, 128], sizes = [8, 128], strides = [1, 1]} : vector<8x256xf32> to vector<8x128xf32>
    %66 = vector.broadcast %15 : vector<1x128xf32> to vector<8x128xf32>
    %67 = arith.addf %65, %66 : vector<8x128xf32>
    %68 = tpu.concatenate %64, %67 in 1 : vector<8x128xf32>, vector<8x128xf32> -> vector<8x256xf32>
    %69 = math.tanh %68 : vector<8x256xf32>
    %70 = vector.extract_strided_slice %69 {offsets = [0, 128], sizes = [8, 128], strides = [1, 1]} : vector<8x256xf32> to vector<8x128xf32>
    %71 = arith.maximumf %59, %70 : vector<8x128xf32>
    %c0_27 = arith.constant 0 : index
    %c0_28 = arith.constant 0 : index
    %72 = vector.load %arg4[%c0_27, %c0_28] : memref<256x256xf32, #tpu.memory_space<vmem>>, vector<256x256xf32>
    %cst_29 = arith.constant dense<0.000000e+00> : vector<8x256xf32>
    %73 = tpu.matmul %69, %72, %cst_29 {dimension_numbers = #tpu.dot_dimension_numbers<[1], [0], [0], [1], [0, 0, 1, 1], [], []>} : vector<8x256xf32>, vector<256x256xf32>, vector<8x256xf32> -> vector<8x256xf32>
    %74 = vector.extract_strided_slice %73 {offsets = [0, 0], sizes = [8, 128], strides = [1, 1]} : vector<8x256xf32> to vector<8x128xf32>
    %75 = vector.extract_strided_slice %13 {offsets = [40, 0], sizes = [8, 128], strides = [1, 1]} : vector<64x128xf32> to vector<8x128xf32>
    %76 = arith.addf %74, %75 : vector<8x128xf32>
    %77 = vector.extract_strided_slice %73 {offsets = [0, 128], sizes = [8, 128], strides = [1, 1]} : vector<8x256xf32> to vector<8x128xf32>
    %78 = vector.broadcast %15 : vector<1x128xf32> to vector<8x128xf32>
    %79 = arith.addf %77, %78 : vector<8x128xf32>
    %80 = tpu.concatenate %76, %79 in 1 : vector<8x128xf32>, vector<8x128xf32> -> vector<8x256xf32>
    %81 = math.tanh %80 : vector<8x256xf32>
    %82 = vector.extract_strided_slice %81 {offsets = [0, 128], sizes = [8, 128], strides = [1, 1]} : vector<8x256xf32> to vector<8x128xf32>
    %83 = arith.maximumf %71, %82 : vector<8x128xf32>
    %c0_30 = arith.constant 0 : index
    %c0_31 = arith.constant 0 : index
    %84 = vector.load %arg4[%c0_30, %c0_31] : memref<256x256xf32, #tpu.memory_space<vmem>>, vector<256x256xf32>
    %cst_32 = arith.constant dense<0.000000e+00> : vector<8x256xf32>
    %85 = tpu.matmul %81, %84, %cst_32 {dimension_numbers = #tpu.dot_dimension_numbers<[1], [0], [0], [1], [0, 0, 1, 1], [], []>} : vector<8x256xf32>, vector<256x256xf32>, vector<8x256xf32> -> vector<8x256xf32>
    %86 = vector.extract_strided_slice %85 {offsets = [0, 0], sizes = [8, 128], strides = [1, 1]} : vector<8x256xf32> to vector<8x128xf32>
    %87 = vector.extract_strided_slice %13 {offsets = [48, 0], sizes = [8, 128], strides = [1, 1]} : vector<64x128xf32> to vector<8x128xf32>
    %88 = arith.addf %86, %87 : vector<8x128xf32>
    %89 = vector.extract_strided_slice %85 {offsets = [0, 128], sizes = [8, 128], strides = [1, 1]} : vector<8x256xf32> to vector<8x128xf32>
    %90 = vector.broadcast %15 : vector<1x128xf32> to vector<8x128xf32>
    %91 = arith.addf %89, %90 : vector<8x128xf32>
    %92 = tpu.concatenate %88, %91 in 1 : vector<8x128xf32>, vector<8x128xf32> -> vector<8x256xf32>
    %93 = math.tanh %92 : vector<8x256xf32>
    %94 = vector.extract_strided_slice %93 {offsets = [0, 128], sizes = [8, 128], strides = [1, 1]} : vector<8x256xf32> to vector<8x128xf32>
    %95 = arith.maximumf %83, %94 : vector<8x128xf32>
    %c0_33 = arith.constant 0 : index
    %c0_34 = arith.constant 0 : index
    %96 = vector.load %arg4[%c0_33, %c0_34] : memref<256x256xf32, #tpu.memory_space<vmem>>, vector<256x256xf32>
    %cst_35 = arith.constant dense<0.000000e+00> : vector<8x256xf32>
    %97 = tpu.matmul %93, %96, %cst_35 {dimension_numbers = #tpu.dot_dimension_numbers<[1], [0], [0], [1], [0, 0, 1, 1], [], []>} : vector<8x256xf32>, vector<256x256xf32>, vector<8x256xf32> -> vector<8x256xf32>
    %98 = vector.extract_strided_slice %97 {offsets = [0, 0], sizes = [8, 128], strides = [1, 1]} : vector<8x256xf32> to vector<8x128xf32>
    %99 = vector.extract_strided_slice %13 {offsets = [56, 0], sizes = [8, 128], strides = [1, 1]} : vector<64x128xf32> to vector<8x128xf32>
    %100 = arith.addf %98, %99 : vector<8x128xf32>
    %101 = vector.extract_strided_slice %97 {offsets = [0, 128], sizes = [8, 128], strides = [1, 1]} : vector<8x256xf32> to vector<8x128xf32>
    %102 = vector.broadcast %15 : vector<1x128xf32> to vector<8x128xf32>
    %103 = arith.addf %101, %102 : vector<8x128xf32>
    %104 = tpu.concatenate %100, %103 in 1 : vector<8x128xf32>, vector<8x128xf32> -> vector<8x256xf32>
    %105 = math.tanh %104 : vector<8x256xf32>
    %106 = vector.extract_strided_slice %105 {offsets = [0, 128], sizes = [8, 128], strides = [1, 1]} : vector<8x256xf32> to vector<8x128xf32>
    %107 = arith.maximumf %95, %106 : vector<8x128xf32>
    %c0_36 = arith.constant 0 : index
    %c0_37 = arith.constant 0 : index
    %108 = vector.load %arg4[%c0_36, %c0_37] : memref<256x256xf32, #tpu.memory_space<vmem>>, vector<256x256xf32>
    %cst_38 = arith.constant dense<0.000000e+00> : vector<8x256xf32>
    %109 = tpu.matmul %105, %108, %cst_38 {dimension_numbers = #tpu.dot_dimension_numbers<[1], [0], [0], [1], [0, 0, 1, 1], [], []>} : vector<8x256xf32>, vector<256x256xf32>, vector<8x256xf32> -> vector<8x256xf32>
    %110 = vector.extract_strided_slice %109 {offsets = [0, 0], sizes = [8, 128], strides = [1, 1]} : vector<8x256xf32> to vector<8x128xf32>
    %111 = vector.extract_strided_slice %109 {offsets = [0, 128], sizes = [8, 128], strides = [1, 1]} : vector<8x256xf32> to vector<8x128xf32>
    %112 = vector.broadcast %15 : vector<1x128xf32> to vector<8x128xf32>
    %113 = arith.addf %111, %112 : vector<8x128xf32>
    %114 = tpu.concatenate %110, %113 in 1 : vector<8x128xf32>, vector<8x128xf32> -> vector<8x256xf32>
    %115 = math.tanh %114 : vector<8x256xf32>
    %116 = vector.extract_strided_slice %115 {offsets = [0, 128], sizes = [8, 128], strides = [1, 1]} : vector<8x256xf32> to vector<8x128xf32>
    %117 = arith.maximumf %107, %116 : vector<8x128xf32>
    %c0_39 = arith.constant 0 : index
    %c0_40 = arith.constant 0 : index
    %118 = vector.load %arg5[%c0_39, %c0_40] : memref<128x128xf32, #tpu.memory_space<vmem>>, vector<128x128xf32>
    %cst_41 = arith.constant dense<0.000000e+00> : vector<8x128xf32>
    %119 = tpu.matmul %117, %118, %cst_41 {dimension_numbers = #tpu.dot_dimension_numbers<[1], [0], [0], [1], [0, 0, 1, 1], [], []>} : vector<8x128xf32>, vector<128x128xf32>, vector<8x128xf32> -> vector<8x128xf32>
    %c0_42 = arith.constant 0 : index
    %c0_43 = arith.constant 0 : index
    %120 = vector.load %arg6[%c0_42, %c0_43] : memref<1x128xf32, #tpu.memory_space<vmem>>, vector<1x128xf32>
    %121 = vector.broadcast %120 : vector<1x128xf32> to vector<8x128xf32>
    %122 = arith.addf %119, %121 : vector<8x128xf32>
    %c0_44 = arith.constant 0 : index
    %c0_45 = arith.constant 0 : index
    %123 = vector.load %arg7[%c0_44, %c0_45] : memref<8x128xf32, #tpu.memory_space<vmem>>, vector<8x128xf32>
    tpu.vector_store %arg7[%c0_44, %c0_45], %122 {strides = array<i32>} : memref<8x128xf32, #tpu.memory_space<vmem>>, vector<8x128xf32>,
    return
  }
}

</mosaic_0001>

<bundles_post_ra>
// kernel: torch_model_forward.1
= control target key start
LH: loop header
LB: loop body
LE: loop exit
PB: predicated region body
PF: predicated region fallthrough
CT: control target
= control target key end

     0   :  { %12 = vsyncpa [#allocation3], 0  ;;  %s2291_s0 = inlined_call_operand.vmem [shape: s32[64,1], index: 0, kind: input, shape index: {}]   ;;  %s2292_s1 = inlined_call_operand.hbm [shape: f32[128,128], index: 1, kind: input, shape index: {}]   ;;  %s2293_s2 = inlined_call_operand.hbm [shape: f32[128,128], index: 2, kind: input, shape index: {}]   ;;  %s2294_s3 = inlined_call_operand.vmem [shape: f32[2,1,128], index: 3, kind: input, shape index: {}]   ;;  %s2295_s4 = inlined_call_operand.hbm [shape: f32[256,256], index: 4, kind: input, shape index: {}]   ;;  %s2296_s5 = inlined_call_operand.hbm [shape: f32[128,128], index: 5, kind: input, shape index: {}]   ;;  %s2297_s6 = inlined_call_operand.vmem [shape: f32[1,128], index: 6, kind: input, shape index: {}]   ;;  %s2298_s7 = inlined_call_operand.vmem [shape: f32[8,128], index: 7, kind: output, shape index: {}]  }
   0x1   :  { %13 = vsyncpa [#allocation5], 0 }
   0x2   :  { %14 = vsyncpa [#allocation8], 0  ;;  %s34_s26 = sshll.u32 %s2293_s2, 4  ;;  %s1336_s27 = smov [#allocation4]   ;;  %s35_s26 = int_to_ptr.hbm [resolvable:$true] %s34_s26 }
   0x3   :  { %s36_s28 = sshll.u32 %s1336_s27, 4  ;;  %s21_s8 = sshll.u32 %s2292_s1, 4  ;;  %s37_s28 = int_to_ptr.vmem [resolvable:$true] %s36_s28  ;;  %s22_s8 = int_to_ptr.hbm [resolvable:$true] %s21_s8 }
   0x4   :  { %s1337_s9 = smov 128   ;;  %s1338_s10 = smov 8  }
   0x5   :  { %42 = dma.hbm_to_vmem [thread:$0]  %s35_s26, 2048, %s37_s28, [#allocation5], %s1337_s9, %s1337_s9, %s1338_s10  }
   0x6   :  { %s1339_s11 = smov [#allocation2]   ;;  %s49_s15 = sshll.u32 %s2295_s4, 4  ;;  %s50_s15 = int_to_ptr.hbm [resolvable:$true] %s49_s15 }
   0x7   :  { %s23_s12 = sshll.u32 %s1339_s11, 4  ;;  %s1340_s2 = smov [#allocation6]   ;;  %s24_s12 = int_to_ptr.vmem [resolvable:$true] %s23_s12 }
   0x8   :  { %29 = dma.hbm_to_vmem [thread:$0]  %s22_s8, 2048, %s24_s12, [#allocation3], %s1337_s9, %s1337_s9, %s1338_s10  }
   0x9   :  { %s51_s16 = sshll.u32 %s1340_s2, 4  ;;  %s62_s1 = sshll.u32 %s2296_s5, 4  ;;  %s52_s16 = int_to_ptr.vmem [resolvable:$true] %s51_s16  ;;  %s63_s1 = int_to_ptr.hbm [resolvable:$true] %s62_s1 }
   0xa   :  { %s1341_s19 = smov 256   ;;  %s1342_s20 = smov 16  }
   0xb   :  { %57 = dma.hbm_to_vmem [thread:$0]  %s50_s15, 8192, %s52_s16, [#allocation5], %s1341_s19, %s1341_s19, %s1342_s20  }
   0xc   :  { %s1343_s21 = smov [#allocation7]  }
   0xd   :  { %s64_s22 = sshll.u32 %s1343_s21, 4  ;;  %s65_s22 = int_to_ptr.vmem [resolvable:$true] %s64_s22 }
   0xe   :  { %70 = dma.hbm_to_vmem [thread:$0]  %s63_s1, 2048, %s65_s22, [#allocation8], %s1337_s9, %s1337_s9, %s1338_s10  }
   0xf   :  { %1330 = dma.done.wait [#allocation3], 2048  }
  0x10   :  { %1331 = vsyncadd [#allocation3], 4294965248 }
  0x11   :  { %1332 = dma.done.wait [#allocation5], 10240  }
  0x12   :  { %1333 = vsyncadd [#allocation5], 4294957056 }
  0x13   :  { %1334 = dma.done.wait [#allocation8], 2048  }
  0x14   :  { %1335 = vsyncadd [#allocation8], 4294965248  ;;  %v1344_v0 = vmov 0   ;;  %v91_v1 = vld [vmem:[%s2291_s0] sm:$0xff]  ;;  %v93_v2 = vld [vmem:[%s2291_s0 + $0x10] sm:$0xff]  ;;  %v89_v25 = vlaneseq  ;;  %v1345_v28 = vmov 1.0  }
  0x15   :  { %1130 = vset.pattern.permute.xlu0 %v1344_v0  ;;  %1131 = vset.pattern.permute.xlu1 %v1344_v0  ;;  %v95_v3 = vld [vmem:[%s2291_s0 + $0x20] sm:$0xff]  ;;  %v162_v4 = vld [vmem:[#allocation2 + $0x78] sm:$0xff]  ;;  %v161_v5 = vld [vmem:[#allocation2 + $0x70] sm:$0xff] }
  0x16   :  { %1132 = vset.pattern.permute.xlu2 %v1344_v0  ;;  %100 = vperm.xlu0 %1130, %v91_v1   ;;  %v160_v6 = vld [vmem:[#allocation2 + $0x68] sm:$0xff]  ;;  %v94_v8 = vld [vmem:[%s2291_s0 + $0x18] sm:$0xff]  ;;  %v159_v10 = vld [vmem:[#allocation2 + $0x60] sm:$0xff]  ;;  %v1423_v26 = vand.u32 127, %v89_v25 }
  0x17   :  { %106 = vperm.xlu1 %1131, %v93_v2   ;;  %112 = vperm.xlu2 %1132, %v95_v3   ;;  %v92_v7 = vld [vmem:[%s2291_s0 + $0x8] sm:$0xff]  ;;  %v158_v11 = vld [vmem:[#allocation2 + $0x58] sm:$0xff]  ;;  %v157_v12 = vld [vmem:[#allocation2 + $0x50] sm:$0xff] }
  0x18   :  { %163 = vmatpush.msra.mxu0 %v162_v4  ;;  %v96_v9 = vld [vmem:[%s2291_s0 + $0x28] sm:$0xff]  ;;  %v97_v14 = vld [vmem:[%s2291_s0 + $0x30] sm:$0xff]  ;;  %v98_v15 = vld [vmem:[%s2291_s0 + $0x38] sm:$0xff] }
  0x19   :  { %v156_v13 = vld [vmem:[#allocation2 + $0x48] sm:$0xff]  ;;  %v155_v16 = vld [vmem:[#allocation2 + $0x40] sm:$0xff]  ;;  %v154_v17 = vld [vmem:[#allocation2 + $0x38] sm:$0xff] }
  0x1a   :  { %164 = vmatpush.msra.mxu0 %v161_v5  ;;  %v153_v18 = vld [vmem:[#allocation2 + $0x30] sm:$0xff]  ;;  %v152_v19 = vld [vmem:[#allocation2 + $0x28] sm:$0xff]  ;;  %v151_v20 = vld [vmem:[#allocation2 + $0x20] sm:$0xff] }
  0x1b   :  { %v150_v21 = vld [vmem:[#allocation2 + $0x18] sm:$0xff]  ;;  %v149_v22 = vld [vmem:[#allocation2 + $0x10] sm:$0xff]  ;;  %v148_v23 = vld [vmem:[#allocation2 + $0x8] sm:$0xff] }
  0x1c   :  { %165 = vmatpush.msra.mxu0 %v160_v6  ;;  %v147_v24 = vld [vmem:[#allocation2] sm:$0xff]  ;;  %v1431_v31 = vld [vmem:[#allocation6 + $0xf0] sm:$0xff]  ;;  %v219_v49 = vld [vmem:[#allocation4 + $0x78] sm:$0xff] }
  0x1d   :  { %v1433_v32 = vld [vmem:[#allocation6 + $0x1f0] sm:$0xff]  ;;  %v1435_v33 = vld [vmem:[#allocation6 + $0xe0] sm:$0xff]  ;;  %331 = vmatpush.msra.mxu2 %v1431_v31  ;;  %224 = vmatpush.msra.mxu1 %v219_v49  ;;  %v217_v53 = vld [vmem:[#allocation4 + $0x68] sm:$0xff] }
  0x1e   :  { %103 = vperm.xlu0 %1130, %v92_v7   ;;  %166 = vmatpush.msra.mxu0 %v159_v10  ;;  %v1439_v34 = vld [vmem:[#allocation6 + $0x1e0] sm:$0xff]  ;;  %v1441_v36 = vld [vmem:[#allocation6 + $0xd0] sm:$0xff]  ;;  %v215_v60 = vld [vmem:[#allocation4 + $0x58] sm:$0xff] }
  0x1f   :  { %109 = vperm.xlu1 %1131, %v94_v8   ;;  %115 = vperm.xlu2 %1132, %v96_v9   ;;  %v1443_v37 = vld [vmem:[#allocation6 + $0x1d0] sm:$0xff]  ;;  %v1448_v38 = vld [vmem:[#allocation6 + $0xc0] sm:$0xff]  ;;  %v213_v2 = vld [vmem:[#allocation4 + $0x48] sm:$0xff] }
  0x20   :  { %167 = vmatpush.msra.mxu0 %v158_v11  ;;  %351 = vmatpush.msra.mxu3 %v1433_v32  ;;  %v1450_v39 = vld [vmem:[#allocation6 + $0x1c0] sm:$0xff]  ;;  %v1456_v40 = vld [vmem:[#allocation6 + $0xb0] sm:$0xff]  ;;  %v211_v8 = vld [vmem:[#allocation4 + $0x38] sm:$0xff] }
  0x21   :  { %332 = vmatpush.msra.mxu2 %v1435_v33  ;;  %v1458_v41 = vld [vmem:[#allocation6 + $0x1b0] sm:$0xff]  ;;  %v1464_v43 = vld [vmem:[#allocation6 + $0xa0] sm:$0xff]  ;;  %v1572_v25 = vld [vmem:[#allocation6 + $0xb8] sm:$0xff] }
  0x22   :  { %168 = vmatpush.msra.mxu0 %v157_v12  ;;  %352 = vmatpush.msra.mxu3 %v1439_v34  ;;  %2344 = vst [vmem:[#allocation12_spill] sm:$0xff] %v1464_v43  ;;  %v1466_v44 = vld [vmem:[#allocation6 + $0x1a0] sm:$0xff]  ;;  %v1470_v45 = vld [vmem:[#allocation6 + $0x90] sm:$0xff]  ;;  %v1542_v12 = vld [vmem:[#allocation6 + $0xf8] sm:$0xff] }
  0x23   :  { %333 = vmatpush.msra.mxu2 %v1441_v36  ;;  %v1472_v46 = vld [vmem:[#allocation6 + $0x190] sm:$0xff]  ;;  %v1477_v47 = vld [vmem:[#allocation6 + $0x80] sm:$0xff]  ;;  %v1590_v49 = vld [vmem:[#allocation6 + $0x198] sm:$0xff] }
  0x24   :  { %169 = vmatpush.msra.mxu0 %v156_v13  ;;  %353 = vmatpush.msra.mxu3 %v1443_v37  ;;  %v1479_v48 = vld [vmem:[#allocation6 + $0x180] sm:$0xff]  ;;  %v218_v50 = vld [vmem:[#allocation4 + $0x70] sm:$0xff]  ;;  %v1544_v13 = vld [vmem:[#allocation6 + $0x1f8] sm:$0xff] }
  0x25   :  { %334 = vmatpush.msra.mxu2 %v1448_v38  ;;  %v1485_v51 = vld [vmem:[#allocation6 + $0x70] sm:$0xff]  ;;  %v1493_v54 = vld [vmem:[#allocation6 + $0x60] sm:$0xff]  ;;  %225 = vmatpush.msra.mxu1 %v218_v50  ;;  %v205_v50 = vld [vmem:[#allocation4 + $0x8] sm:$0xff] }
  0x26   :  { %118 = vperm.xlu0 %1130, %v97_v14   ;;  %170 = vmatpush.msra.mxu0 %v155_v16  ;;  %v1487_v52 = vld [vmem:[#allocation6 + $0x170] sm:$0xff]  ;;  %v1495_v55 = vld [vmem:[#allocation6 + $0x160] sm:$0xff]  ;;  %v1554_v16 = vld [vmem:[#allocation6 + $0x1e8] sm:$0xff] }
  0x27   :  { %121 = vperm.xlu1 %1131, %v98_v15   ;;  %354 = vmatpush.msra.mxu3 %v1450_v39  ;;  %v216_v56 = vld [vmem:[#allocation4 + $0x60] sm:$0xff]  ;;  %v1499_v58 = vld [vmem:[#allocation6 + $0x50] sm:$0xff]  ;;  %v1550_v15 = vld [vmem:[#allocation6 + $0xe8] sm:$0xff] }
  0x28   :  { %171 = vmatpush.msra.mxu0 %v154_v17  ;;  %335 = vmatpush.msra.mxu2 %v1456_v40  ;;  %v1501_v59 = vld [vmem:[#allocation6 + $0x150] sm:$0xff]  ;;  %v1506_v61 = vld [vmem:[#allocation6 + $0x40] sm:$0xff]  ;;  %v1557_v17 = vld [vmem:[#allocation6 + $0xd8] sm:$0xff] }
  0x29   :  { %355 = vmatpush.msra.mxu3 %v1458_v41  ;;  %226 = vmatpush.msra.mxu1 %v217_v53  ;;  %v1508_v62 = vld [vmem:[#allocation6 + $0x140] sm:$0xff]  ;;  %v214_v63 = vld [vmem:[#allocation4 + $0x50] sm:$0xff]  ;;  %v1597_v53 = vld [vmem:[#allocation6 + $0x188] sm:$0xff] }
  0x2a   :  { %172 = vmatpush.msra.mxu0 %v153_v18  ;;  %336 = vmatpush.msra.mxu2 %v1464_v43  ;;  %2345 = vst [vmem:[#allocation13_spill] sm:$0xff] %v1508_v62  ;;  %v1514_v0 = vld [vmem:[#allocation6 + $0x30] sm:$0xff]  ;;  %v1522_v3 = vld [vmem:[#allocation6 + $0x20] sm:$0xff]  ;;  %v209_v18 = vld [vmem:[#allocation4 + $0x28] sm:$0xff] }
  0x2b   :  { %356 = vmatpush.msra.mxu3 %v1466_v44  ;;  %227 = vmatpush.msra.mxu1 %v216_v56  ;;  %2346 = vst [vmem:[#allocation14_spill] sm:$0xff] %v1514_v0  ;;  %v1516_v1 = vld [vmem:[#allocation6 + $0x130] sm:$0xff]  ;;  %v1524_v4 = vld [vmem:[#allocation6 + $0x120] sm:$0xff]  ;;  %v1601_v56 = vld [vmem:[#allocation6 + $0x78] sm:$0xff] }
  0x2c   :  { %173 = vmatpush.msra.mxu0 %v152_v19  ;;  %337 = vmatpush.msra.mxu2 %v1470_v45  ;;  %2347 = vst [vmem:[#allocation15_spill] sm:$0xff] %v1516_v1  ;;  %v212_v5 = vld [vmem:[#allocation4 + $0x40] sm:$0xff]  ;;  %v1528_v6 = vld [vmem:[#allocation6 + $0x10] sm:$0xff] }
  0x2d   :  { %357 = vmatpush.msra.mxu3 %v1472_v46  ;;  %228 = vmatpush.msra.mxu1 %v215_v60  ;;  %2348 = vst [vmem:[#allocation16_spill] sm:$0xff] %v1522_v3  ;;  %v1530_v7 = vld [vmem:[#allocation6 + $0x110] sm:$0xff]  ;;  %v1535_v10 = vld [vmem:[#allocation6] sm:$0xff]  ;;  %v1608_v60 = vld [vmem:[#allocation6 + $0x68] sm:$0xff] }
  0x2e   :  { %174 = vmatpush.msra.mxu0 %v151_v20  ;;  %338 = vmatpush.msra.mxu2 %v1477_v47  ;;  %2349 = vst [vmem:[#allocation17_spill] sm:$0xff] %v1524_v4  ;;  %v1537_v11 = vld [vmem:[#allocation6 + $0x100] sm:$0xff]  ;;  %v210_v14 = vld [vmem:[#allocation4 + $0x30] sm:$0xff]  ;;  %v1560_v20 = vld [vmem:[#allocation6 + $0x1d8] sm:$0xff] }
  0x2f   :  { %358 = vmatpush.msra.mxu3 %v1479_v48  ;;  %229 = vmatpush.msra.mxu1 %v214_v63  ;;  %2350 = vst [vmem:[#allocation18_spill] sm:$0xff] %v1528_v6  ;;  %v1611_v63 = vld [vmem:[#allocation6 + $0x168] sm:$0xff] }
  0x30   :  { %175 = vmatpush.msra.mxu0 %v150_v21  ;;  %339 = vmatpush.msra.mxu2 %v1485_v51  ;;  %2351 = vst [vmem:[#allocation19_spill] sm:$0xff] %v1530_v7  ;;  %v2299_v21 = vmov 0.0  }
  0x31   :  { %359 = vmatpush.msra.mxu3 %v1487_v52  ;;  %230 = vmatpush.msra.mxu1 %v213_v2  ;;  %2352 = vst [vmem:[#allocation20_spill] sm:$0xff] %v1535_v10  ;;  %v1615_v2 = vld [vmem:[#allocation6 + $0x58] sm:$0xff] }
  0x32   :  { %176 = vmatpush.msra.mxu0 %v149_v22  ;;  %340 = vmatpush.msra.mxu2 %v1493_v54  ;;  %2353 = vst [vmem:[#allocation21_spill] sm:$0xff] %v1537_v11  ;;  %v1564_v22 = vld [vmem:[#allocation6 + $0xc8] sm:$0xff] }
  0x33   :  { %360 = vmatpush.msra.mxu3 %v1495_v55  ;;  %231 = vmatpush.msra.mxu1 %v212_v5  ;;  %v1618_v5 = vld [vmem:[#allocation6 + $0x158] sm:$0xff] }
  0x34   :  { %177 = vmatpush.msra.mxu0 %v148_v23  ;;  %341 = vmatpush.msra.mxu2 %v1499_v58  ;;  %v208_v23 = vld [vmem:[#allocation4 + $0x20] sm:$0xff]  ;;  %2354 = vst [vmem:[#allocation22_spill] sm:$0xff] %v1618_v5 }
  0x35   :  { %361 = vmatpush.msra.mxu3 %v1501_v59  ;;  %232 = vmatpush.msra.mxu1 %v211_v8  ;;  %v1622_v8 = vld [vmem:[#allocation6 + $0x48] sm:$0xff] }
  0x36   :  { %178 = vmatpush.msra.mxu0 %v147_v24  ;;  %342 = vmatpush.msra.mxu2 %v1506_v61  ;;  %v1568_v24 = vld [vmem:[#allocation6 + $0x1c8] sm:$0xff]  ;;  %2355 = vst [vmem:[#allocation23_spill] sm:$0xff] %v1622_v8 }
  0x37   :  { %362 = vmatpush.msra.mxu3 %v1508_v62  ;;  %233 = vmatpush.msra.mxu1 %v210_v14  ;;  %v1629_v14 = vld [vmem:[#allocation6 + $0x38] sm:$0xff] }
  0x38   :  { %414 = vmatpush.msrb.mxu0 %v1431_v31  ;;  %343 = vmatpush.msra.mxu2 %v1514_v0  ;;  %2357 = vst [vmem:[#allocation25_spill] sm:$0xff] %v1629_v14 }
  0x39   :  { %363 = vmatpush.msra.mxu3 %v1516_v1  ;;  %234 = vmatpush.msra.mxu1 %v209_v18  ;;  %v1632_v18 = vld [vmem:[#allocation6 + $0x138] sm:$0xff] }
  0x3a   :  { %415 = vmatpush.msrb.mxu0 %v1435_v33  ;;  %344 = vmatpush.msra.mxu2 %v1522_v3  ;;  %2358 = vst [vmem:[#allocation26_spill] sm:$0xff] %v1632_v18 }
  0x3b   :  { %364 = vmatpush.msra.mxu3 %v1524_v4  ;;  %235 = vmatpush.msra.mxu1 %v208_v23  ;;  %v1639_v23 = vld [vmem:[#allocation6 + $0x128] sm:$0xff] }
  0x3c   :  { %416 = vmatpush.msrb.mxu0 %v1441_v36  ;;  %345 = vmatpush.msra.mxu2 %v1528_v6  ;;  %2360 = vst [vmem:[#allocation28_spill] sm:$0xff] %v1639_v23 }
  0x3d   :  { %365 = vmatpush.msra.mxu3 %v1530_v7 }
  0x3e   :  { %417 = vmatpush.msrb.mxu0 %v1448_v38  ;;  %346 = vmatpush.msra.mxu2 %v1535_v10 }
  0x3f   :  { %366 = vmatpush.msra.mxu3 %v1537_v11  ;;  %347 = vmatmul.f32.vlgmr.msra.gmra.mxu2 %v2299_v21 }
  0x40   :  { %418 = vmatpush.msrb.mxu0 %v1456_v40  ;;  %371 = vmatpush.msrb.mxu2 %v1542_v12 }
  0x41   :  { %391 = vmatpush.msrb.mxu3 %v1544_v13 }
  0x42   :  { %419 = vmatpush.msrb.mxu0 %v1464_v43  ;;  %372 = vmatpush.msrb.mxu2 %v1550_v15 }
  0x43   :  { %367 = vmatmul.f32.vlgmr.msra.gmra.mxu3 %v2299_v21  ;;  %v1653_v21 = vld [vmem:[#allocation6 + $0x108] sm:$0xff] }
  0x44   :  { %420 = vmatpush.msrb.mxu0 %v1470_v45  ;;  %392 = vmatpush.msrb.mxu3 %v1554_v16  ;;  %2364 = vst [vmem:[#allocation32_spill] sm:$0xff] %v1653_v21 }
  0x45   :  { %373 = vmatpush.msrb.mxu2 %v1557_v17 }
  0x46   :  { %421 = vmatpush.msrb.mxu0 %v1477_v47  ;;  %393 = vmatpush.msrb.mxu3 %v1560_v20 }
  0x47   :  { %374 = vmatpush.msrb.mxu2 %v1564_v22 }
  0x48   :  { %422 = vmatpush.msrb.mxu0 %v1485_v51  ;;  %394 = vmatpush.msrb.mxu3 %v1568_v24 }
  0x49   :  { %375 = vmatpush.msrb.mxu2 %v1572_v25 }
  0x4a   :  { %423 = vmatpush.msrb.mxu0 %v1493_v54 }
  0x4c   :  { %424 = vmatpush.msrb.mxu0 %v1499_v58 }
  0x4e   :  { %425 = vmatpush.msrb.mxu0 %v1506_v61 }
  0x50   :  { %426 = vmatpush.msrb.mxu0 %v1514_v0 }
  0x52   :  { %427 = vmatpush.msrb.mxu0 %v1522_v3 }
  0x54   :  { %428 = vmatpush.msrb.mxu0 %v1528_v6 }
  0x56   :  { %429 = vmatpush.msrb.mxu0 %v1535_v10 }
  0x71   :  { %v113_v42 = vpop.permute.xlu2 %112 }
  0x72   :  { %vm127_vm4 = vcmp.eq.s32.totalorder %v113_v42, %v1423_v26  ;;  %v1587_v42 = vld [vmem:[#allocation6 + $0x98] sm:$0xff] }
  0x79   :  { %v116_v57 = vpop.permute.xlu2 %115 }
  0x7a   :  { %vm128_vm5 = vcmp.eq.s32.totalorder %v116_v57, %v1423_v26  ;;  %v1604_v57 = vld [vmem:[#allocation6 + $0x178] sm:$0xff] }
  0x88   :  { %v101_v27 = vpop.permute.xlu0 %100 }
  0x89   :  { %vm123_vm0 = vcmp.eq.s32.totalorder %v101_v27, %v1423_v26  ;;  %v107_v30 = vpop.permute.xlu1 %106  ;;  %v1576_v27 = vld [vmem:[#allocation6 + $0x1b8] sm:$0xff] }
  0x8a   :  { %1110 = vmatmul.msk.f32.vlgmr.msra.gmra.mxu0 %vm123_vm0, %v1345_v28  ;;  %vm125_vm2 = vcmp.eq.s32.totalorder %v107_v30, %v1423_v26  ;;  %v1579_v30 = vld [vmem:[#allocation6 + $0xa8] sm:$0xff]  ;;  %395 = vmatpush.msrb.mxu3 %v1576_v27 }
  0x8b   :  { %376 = vmatpush.msrb.mxu2 %v1579_v30  ;;  %501 = vmatpush.msra.mxu0 %v1431_v31 }
  0x8d   :  { %377 = vmatpush.msrb.mxu2 %v1587_v42  ;;  %502 = vmatpush.msra.mxu0 %v1435_v33 }
  0x8f   :  { %503 = vmatpush.msra.mxu0 %v1441_v36 }
  0x90   :  { %v104_v29 = vpop.permute.xlu0 %103 }
  0x91   :  { %vm124_vm1 = vcmp.eq.s32.totalorder %v104_v29, %v1423_v26  ;;  %v110_v35 = vpop.permute.xlu1 %109  ;;  %v207_v29 = vld [vmem:[#allocation4 + $0x18] sm:$0xff]  ;;  %504 = vmatpush.msra.mxu0 %v1448_v38 }
  0x92   :  { %1111 = vmatmul.msk.f32.gmra.mxu0 %vm124_vm1, %v1345_v28  ;;  %vm126_vm3 = vcmp.eq.s32.totalorder %v110_v35, %v1423_v26  ;;  %v206_v35 = vld [vmem:[#allocation4 + $0x10] sm:$0xff]  ;;  %236 = vmatpush.msra.mxu1 %v207_v29  ;;  %v1643_v29 = vld [vmem:[#allocation6 + $0x18] sm:$0xff] }
  0x93   :  { %505 = vmatpush.msra.mxu0 %v1456_v40  ;;  %2361 = vst [vmem:[#allocation29_spill] sm:$0xff] %v1643_v29 }
  0x94   :  { %237 = vmatpush.msra.mxu1 %v206_v35  ;;  %v1646_v35 = vld [vmem:[#allocation6 + $0x118] sm:$0xff] }
  0x95   :  { %506 = vmatpush.msra.mxu0 %v1464_v43  ;;  %2362 = vst [vmem:[#allocation30_spill] sm:$0xff] %v1646_v35  ;;  %v2365_v43 = vmov 0.0  }
  0x96   :  { %238 = vmatpush.msra.mxu1 %v205_v50  ;;  %v1650_v50 = vld [vmem:[#allocation6 + $0x8] sm:$0xff] }
  0x97   :  { %507 = vmatpush.msra.mxu0 %v1470_v45  ;;  %2363 = vst [vmem:[#allocation31_spill] sm:$0xff] %v1650_v50 }
  0x98   :  { %v119_v9 = vpop.permute.xlu0 %118 }
  0x99   :  { %vm129_vm6 = vcmp.eq.s32.totalorder %v119_v9, %v1423_v26  ;;  %v122_v19 = vpop.permute.xlu1 %121  ;;  %v1625_v9 = vld [vmem:[#allocation6 + $0x148] sm:$0xff]  ;;  %508 = vmatpush.msra.mxu0 %v1477_v47 }
  0x9a   :  { %1112 = vmatmul.msk.f32.gmra.mxu0 %vm125_vm2, %v1345_v28  ;;  %vm130_vm7 = vcmp.eq.s32.totalorder %v122_v19, %v1423_v26  ;;  %v1584_v26 = vld [vmem:[#allocation6 + $0x1a8] sm:$0xff]  ;;  %2356 = vst [vmem:[#allocation24_spill] sm:$0xff] %v1625_v9 }
  0x9b   :  { %396 = vmatpush.msrb.mxu3 %v1584_v26  ;;  %v1636_v19 = vld [vmem:[#allocation6 + $0x28] sm:$0xff]  ;;  %509 = vmatpush.msra.mxu0 %v1485_v51 }
  0x9c   :  { %2359 = vst [vmem:[#allocation27_spill] sm:$0xff] %v1636_v19 }
  0x9d   :  { %397 = vmatpush.msrb.mxu3 %v1590_v49  ;;  %510 = vmatpush.msra.mxu0 %v1493_v54 }
  0x9f   :  { %398 = vmatpush.msrb.mxu3 %v1597_v53  ;;  %511 = vmatpush.msra.mxu0 %v1499_v58 }
  0xa1   :  { %399 = vmatpush.msrb.mxu3 %v1604_v57  ;;  %512 = vmatpush.msra.mxu0 %v1506_v61 }
  0xa2   :  { %1113 = vmatmul.msk.f32.gmra.mxu0 %vm126_vm3, %v1345_v28 }
  0xa3   :  { %400 = vmatpush.msrb.mxu3 %v1611_v63  ;;  %513 = vmatpush.msra.mxu0 %v1514_v0 }
  0xa5   :  { %401 = vmatpush.msrb.mxu3 %v1618_v5  ;;  %514 = vmatpush.msra.mxu0 %v1522_v3 }
  0xa7   :  { %402 = vmatpush.msrb.mxu3 %v1625_v9  ;;  %515 = vmatpush.msra.mxu0 %v1528_v6 }
  0xa9   :  { %403 = vmatpush.msrb.mxu3 %v1632_v18  ;;  %516 = vmatpush.msra.mxu0 %v1535_v10 }
  0xaa   :  { %1114 = vmatmul.msk.f32.gmra.mxu0 %vm127_vm4, %v1345_v28 }
  0xab   :  { %404 = vmatpush.msrb.mxu3 %v1639_v23 }
  0xad   :  { %405 = vmatpush.msrb.mxu3 %v1646_v35 }
  0xaf   :  { %406 = vmatpush.msrb.mxu3 %v1653_v21 }
  0xb0   :  { %407 = vmatmul.f32.vlgmr.msrb.gmra.mxu3 %v2365_v43 }
  0xb1   :  { %474 = vmatpush.msra.mxu3 %v1544_v13 }
  0xb2   :  { %1115 = vmatmul.msk.f32.gmra.mxu0 %vm128_vm5, %v1345_v28 }
  0xb3   :  { %475 = vmatpush.msra.mxu3 %v1554_v16 }
  0xb5   :  { %476 = vmatpush.msra.mxu3 %v1560_v20 }
  0xb7   :  { %477 = vmatpush.msra.mxu3 %v1568_v24 }
  0xb9   :  { %478 = vmatpush.msra.mxu3 %v1576_v27 }
  0xba   :  { %1116 = vmatmul.msk.f32.gmra.mxu0 %vm129_vm6, %v1345_v28 }
  0xbb   :  { %479 = vmatpush.msra.mxu3 %v1584_v26 }
  0xbd   :  { %480 = vmatpush.msra.mxu3 %v1590_v49 }
  0xbf   :  { %481 = vmatpush.msra.mxu3 %v1597_v53 }
  0xc1   :  { %482 = vmatpush.msra.mxu3 %v1604_v57 }
  0xc2   :  { %1117 = vmatmul.msk.f32.gmra.mxu0 %vm130_vm7, %v1345_v28  ;;  %v1594_v28 = vld [vmem:[#allocation6 + $0x88] sm:$0xff] }
  0xc3   :  { %378 = vmatpush.msrb.mxu2 %v1594_v28  ;;  %483 = vmatpush.msra.mxu3 %v1611_v63 }
  0xc5   :  { %379 = vmatpush.msrb.mxu2 %v1601_v56  ;;  %484 = vmatpush.msra.mxu3 %v1618_v5 }
  0xc6   :  { %v368_v3 = vpop.f32.mrf.mxu3 }
  0xc7   :  { %380 = vmatpush.msrb.mxu2 %v1608_v60  ;;  %485 = vmatpush.msra.mxu3 %v1625_v9 }
  0xc9   :  { %381 = vmatpush.msrb.mxu2 %v1615_v2  ;;  %486 = vmatpush.msra.mxu3 %v1632_v18 }
  0xcb   :  { %382 = vmatpush.msrb.mxu2 %v1622_v8  ;;  %487 = vmatpush.msra.mxu3 %v1639_v23 }
  0xcd   :  { %383 = vmatpush.msrb.mxu2 %v1629_v14  ;;  %488 = vmatpush.msra.mxu3 %v1646_v35 }
  0xcf   :  { %384 = vmatpush.msrb.mxu2 %v1636_v19  ;;  %489 = vmatpush.msra.mxu3 %v1653_v21 }
  0xd1   :  { %385 = vmatpush.msrb.mxu2 %v1643_v29  ;;  %561 = vmatpush.msrb.mxu3 %v1544_v13 }
  0xd3   :  { %386 = vmatpush.msrb.mxu2 %v1650_v50  ;;  %562 = vmatpush.msrb.mxu3 %v1554_v16 }
  0xd4   :  { %387 = vmatmul.f32.vlgmr.msrb.gmra.mxu2 %v2365_v43  ;;  %v204_v43 = vld [vmem:[#allocation4] sm:$0xff] }
  0xd5   :  { %454 = vmatpush.msra.mxu2 %v1542_v12  ;;  %239 = vmatpush.msra.mxu1 %v204_v43 }
  0xd6   :  { %563 = vmatpush.msrb.mxu3 %v1560_v20 }
  0xd7   :  { %455 = vmatpush.msra.mxu2 %v1550_v15  ;;  %434 = vmatpush.msrb.mxu1 %v1433_v32 }
  0xd8   :  { %564 = vmatpush.msrb.mxu3 %v1568_v24 }
  0xd9   :  { %456 = vmatpush.msra.mxu2 %v1557_v17  ;;  %435 = vmatpush.msrb.mxu1 %v1439_v34 }
  0xda   :  { %565 = vmatpush.msrb.mxu3 %v1576_v27 }
  0xdb   :  { %457 = vmatpush.msra.mxu2 %v1564_v22  ;;  %436 = vmatpush.msrb.mxu1 %v1443_v37 }
  0xdc   :  { %566 = vmatpush.msrb.mxu3 %v1584_v26 }
  0xdd   :  { %458 = vmatpush.msra.mxu2 %v1572_v25  ;;  %437 = vmatpush.msrb.mxu1 %v1450_v39 }
  0xde   :  { %567 = vmatpush.msrb.mxu3 %v1590_v49 }
  0xdf   :  { %459 = vmatpush.msra.mxu2 %v1579_v30  ;;  %438 = vmatpush.msrb.mxu1 %v1458_v41 }
  0xe0   :  { %568 = vmatpush.msrb.mxu3 %v1597_v53 }
  0xe1   :  { %460 = vmatpush.msra.mxu2 %v1587_v42  ;;  %439 = vmatpush.msrb.mxu1 %v1466_v44 }
  0xe2   :  { %569 = vmatpush.msrb.mxu3 %v1604_v57 }
  0xe3   :  { %461 = vmatpush.msra.mxu2 %v1594_v28  ;;  %440 = vmatpush.msrb.mxu1 %v1472_v46 }
  0xe4   :  { %570 = vmatpush.msrb.mxu3 %v1611_v63 }
  0xe5   :  { %462 = vmatpush.msra.mxu2 %v1601_v56  ;;  %441 = vmatpush.msrb.mxu1 %v1479_v48 }
  0xe6   :  { %571 = vmatpush.msrb.mxu3 %v1618_v5 }
  0xe7   :  { %463 = vmatpush.msra.mxu2 %v1608_v60  ;;  %442 = vmatpush.msrb.mxu1 %v1487_v52 }
  0xe8   :  { %572 = vmatpush.msrb.mxu3 %v1625_v9 }
  0xe9   :  { %464 = vmatpush.msra.mxu2 %v1615_v2  ;;  %443 = vmatpush.msrb.mxu1 %v1495_v55 }
  0xea   :  { %573 = vmatpush.msrb.mxu3 %v1632_v18 }
  0xeb   :  { %465 = vmatpush.msra.mxu2 %v1622_v8  ;;  %444 = vmatpush.msrb.mxu1 %v1501_v59 }
  0xec   :  { %574 = vmatpush.msrb.mxu3 %v1639_v23 }
  0xed   :  { %466 = vmatpush.msra.mxu2 %v1629_v14  ;;  %445 = vmatpush.msrb.mxu1 %v1508_v62 }
  0xee   :  { %575 = vmatpush.msrb.mxu3 %v1646_v35 }
  0xef   :  { %467 = vmatpush.msra.mxu2 %v1636_v19  ;;  %446 = vmatpush.msrb.mxu1 %v1516_v1 }
  0xf0   :  { %576 = vmatpush.msrb.mxu3 %v1653_v21 }
  0xf1   :  { %468 = vmatpush.msra.mxu2 %v1643_v29  ;;  %447 = vmatpush.msrb.mxu1 %v1524_v4 }
  0xf3   :  { %469 = vmatpush.msra.mxu2 %v1650_v50  ;;  %448 = vmatpush.msrb.mxu1 %v1530_v7 }
  0xf5   :  { %541 = vmatpush.msrb.mxu2 %v1542_v12  ;;  %449 = vmatpush.msrb.mxu1 %v1537_v11 }
  0xf7   :  { %542 = vmatpush.msrb.mxu2 %v1550_v15 }
  0xf9   :  { %543 = vmatpush.msrb.mxu2 %v1557_v17 }
  0xfb   :  { %544 = vmatpush.msrb.mxu2 %v1564_v22 }
  0xfd   :  { %545 = vmatpush.msrb.mxu2 %v1572_v25 }
  0xff   :  { %546 = vmatpush.msrb.mxu2 %v1579_v30 }
 0x101   :  { %547 = vmatpush.msrb.mxu2 %v1587_v42 }
 0x103   :  { %548 = vmatpush.msrb.mxu2 %v1594_v28 }
 0x105   :  { %549 = vmatpush.msrb.mxu2 %v1601_v56 }
 0x107   :  { %v180_v43 = vpop.f32.mrf.mxu0  ;;  %550 = vmatpush.msrb.mxu2 %v1608_v60 }
 0x108   :  { %240 = vmatmul.f32.vlgmr.msra.gmra.mxu1 %v180_v43 }
 0x109   :  { %521 = vmatpush.msra.mxu1 %v1433_v32  ;;  %551 = vmatpush.msrb.mxu2 %v1615_v2 }
 0x10b   :  { %522 = vmatpush.msra.mxu1 %v1439_v34  ;;  %552 = vmatpush.msrb.mxu2 %v1622_v8 }
 0x10d   :  { %523 = vmatpush.msra.mxu1 %v1443_v37  ;;  %553 = vmatpush.msrb.mxu2 %v1629_v14 }
 0x10f   :  { %v183_v43 = vpop.f32.mrf.mxu0  ;;  %524 = vmatpush.msra.mxu1 %v1450_v39  ;;  %554 = vmatpush.msrb.mxu2 %v1636_v19  ;;  %v348_v19 = vpop.f32.mrf.mxu2 }
 0x110   :  { %243 = vmatmul.f32.gmra.mxu1 %v183_v43 }
 0x111   :  { %525 = vmatpush.msra.mxu1 %v1458_v41  ;;  %555 = vmatpush.msrb.mxu2 %v1643_v29 }
 0x113   :  { %526 = vmatpush.msra.mxu1 %v1466_v44  ;;  %556 = vmatpush.msrb.mxu2 %v1650_v50 }
 0x115   :  { %527 = vmatpush.msra.mxu1 %v1472_v46 }
 0x117   :  { %v186_v43 = vpop.f32.mrf.mxu0  ;;  %528 = vmatpush.msra.mxu1 %v1479_v48 }
 0x118   :  { %246 = vmatmul.f32.gmra.mxu1 %v186_v43 }
 0x119   :  { %529 = vmatpush.msra.mxu1 %v1487_v52 }
 0x11b   :  { %530 = vmatpush.msra.mxu1 %v1495_v55 }
 0x11d   :  { %531 = vmatpush.msra.mxu1 %v1501_v59 }
 0x11f   :  { %v189_v10 = vpop.f32.mrf.mxu0  ;;  %532 = vmatpush.msra.mxu1 %v1508_v62 }
 0x120   :  { %249 = vmatmul.f32.gmra.mxu1 %v189_v10 }
 0x121   :  { %533 = vmatpush.msra.mxu1 %v1516_v1 }
 0x123   :  { %534 = vmatpush.msra.mxu1 %v1524_v4 }
 0x125   :  { %535 = vmatpush.msra.mxu1 %v1530_v7 }
 0x127   :  { %v192_v50 = vpop.f32.mrf.mxu0  ;;  %536 = vmatpush.msra.mxu1 %v1537_v11 }
 0x128   :  { %252 = vmatmul.f32.gmra.mxu1 %v192_v50 }
 0x12f   :  { %v195_v43 = vpop.f32.mrf.mxu0 }
 0x130   :  { %255 = vmatmul.f32.gmra.mxu1 %v195_v43 }
 0x133   :  { %v408_v10 = vpop.f32.mrf.mxu3 }
 0x137   :  { %v198_v29 = vpop.f32.mrf.mxu0 }
 0x138   :  { %258 = vmatmul.f32.gmra.mxu1 %v198_v29 }
 0x13f   :  { %v201_v6 = vpop.f32.mrf.mxu0 }
 0x140   :  { %261 = vmatmul.f32.gmra.mxu1 %v201_v6 }
 0x157   :  { %v388_v14 = vpop.f32.mrf.mxu2 }
 0x158   :  { %v409_v0 = vadd.f32 %v408_v10, %v388_v14  ;;  %v2367_v10 = vld [vmem:[#allocation12_spill] sm:$0xff] }
 0x15a   :  { %1136 = vtanh.f32 %v409_v0  ;;  %v1784_v0 = vld [vmem:[%s2294_s3] ss:$0 sm:$0xff] }
 0x160   :  { %v1137_v8 = vpop.eup %1136 }
 0x161   :  { %450 = vmatmul.f32.vlgmr.msrb.gmra.mxu1 %v1137_v8  ;;  %490 = vmatmul.f32.vlgmr.msra.gmra.mxu3 %v1137_v8  ;;  %v369_v8 = vadd.f32 %v368_v3, %v348_v19 }
 0x162   :  { %606 = vmatpush.msrb.mxu1 %v1433_v32  ;;  %646 = vmatpush.msra.mxu3 %v1544_v13 }
 0x164   :  { %607 = vmatpush.msrb.mxu1 %v1439_v34  ;;  %647 = vmatpush.msra.mxu3 %v1554_v16 }
 0x166   :  { %608 = vmatpush.msrb.mxu1 %v1443_v37  ;;  %648 = vmatpush.msra.mxu3 %v1560_v20 }
 0x168   :  { %609 = vmatpush.msrb.mxu1 %v1450_v39  ;;  %649 = vmatpush.msra.mxu3 %v1568_v24 }
 0x16a   :  { %610 = vmatpush.msrb.mxu1 %v1458_v41  ;;  %650 = vmatpush.msra.mxu3 %v1576_v27 }
 0x16c   :  { %611 = vmatpush.msrb.mxu1 %v1466_v44  ;;  %651 = vmatpush.msra.mxu3 %v1584_v26 }
 0x16e   :  { %612 = vmatpush.msrb.mxu1 %v1472_v46  ;;  %652 = vmatpush.msra.mxu3 %v1590_v49 }
 0x170   :  { %613 = vmatpush.msrb.mxu1 %v1479_v48  ;;  %653 = vmatpush.msra.mxu3 %v1597_v53 }
 0x172   :  { %614 = vmatpush.msrb.mxu1 %v1487_v52  ;;  %654 = vmatpush.msra.mxu3 %v1604_v57 }
 0x174   :  { %615 = vmatpush.msrb.mxu1 %v1495_v55  ;;  %655 = vmatpush.msra.mxu3 %v1611_v63 }
 0x176   :  { %616 = vmatpush.msrb.mxu1 %v1501_v59  ;;  %656 = vmatpush.msra.mxu3 %v1618_v5 }
 0x178   :  { %617 = vmatpush.msrb.mxu1 %v1508_v62  ;;  %657 = vmatpush.msra.mxu3 %v1625_v9 }
 0x17a   :  { %618 = vmatpush.msrb.mxu1 %v1516_v1  ;;  %658 = vmatpush.msra.mxu3 %v1632_v18 }
 0x17c   :  { %619 = vmatpush.msrb.mxu1 %v1524_v4  ;;  %659 = vmatpush.msra.mxu3 %v1639_v23 }
 0x17e   :  { %620 = vmatpush.msrb.mxu1 %v1530_v7  ;;  %660 = vmatpush.msra.mxu3 %v1646_v35  ;;  %v2378_v35 = vld [vmem:[#allocation20_spill] sm:$0xff]  ;;  %v2379_v7 = vld [vmem:[#allocation31_spill] sm:$0xff] }
 0x180   :  { %621 = vmatpush.msrb.mxu1 %v1537_v11  ;;  %661 = vmatpush.msra.mxu3 %v1653_v21  ;;  %v2377_v11 = vld [vmem:[#allocation29_spill] sm:$0xff] }
 0x185   :  { %v241_v6 = vpop.f32.mrf.mxu1 }
 0x186   :  { %v242_v14 = vadd.f32 %v1784_v0, %v241_v6 }
 0x188   :  { %v411_v29 = vadd.f32 %v369_v8, %v242_v14 }
 0x18a   :  { %1138 = vtanh.f32 %v411_v29 }
 0x18d   :  { %v244_v3 = vpop.f32.mrf.mxu1 }
 0x190   :  { %v1139_v19 = vpop.eup %1138 }
 0x191   :  { %430 = vmatmul.f32.vlgmr.msrb.gmra.mxu0 %v1139_v19  ;;  %470 = vmatmul.f32.vlgmr.msra.gmra.mxu2 %v1139_v19  ;;  %v2370_v19 = vld [vmem:[#allocation23_spill] sm:$0xff] }
 0x192   :  { %586 = vmatpush.msrb.mxu0 %v1431_v31  ;;  %626 = vmatpush.msra.mxu2 %v1542_v12 }
 0x194   :  { %587 = vmatpush.msrb.mxu0 %v1435_v33  ;;  %627 = vmatpush.msra.mxu2 %v1550_v15 }
 0x195   :  { %v247_v50 = vpop.f32.mrf.mxu1 }
 0x196   :  { %v1808_v43 = vadd.f32 %v1784_v0, %v247_v50  ;;  %588 = vmatpush.msrb.mxu0 %v1441_v36  ;;  %628 = vmatpush.msra.mxu2 %v1557_v17  ;;  %v2371_v50 = vld [vmem:[#allocation14_spill] sm:$0xff] }
 0x198   :  { %2366 = vst [vmem:[#allocation33_spill] sm:$0xff] %v1808_v43  ;;  %589 = vmatpush.msrb.mxu0 %v1448_v38  ;;  %629 = vmatpush.msra.mxu2 %v1564_v22  ;;  %v2374_v43 = vld [vmem:[#allocation27_spill] sm:$0xff] }
 0x19a   :  { %590 = vmatpush.msrb.mxu0 %v1456_v40  ;;  %630 = vmatpush.msra.mxu2 %v1572_v25 }
 0x19c   :  { %591 = vmatpush.msrb.mxu0 %v2367_v10  ;;  %631 = vmatpush.msra.mxu2 %v1579_v30 }
 0x19d   :  { %v250_v6 = vpop.f32.mrf.mxu1 }
 0x19e   :  { %v1819_v8 = vadd.f32 %v1784_v0, %v250_v6  ;;  %592 = vmatpush.msrb.mxu0 %v1470_v45  ;;  %632 = vmatpush.msra.mxu2 %v1587_v42  ;;  %v2372_v6 = vld [vmem:[#allocation25_spill] sm:$0xff] }
 0x1a0   :  { %2368 = vst [vmem:[#allocation12_spill] sm:$0xff] %v1819_v8  ;;  %593 = vmatpush.msrb.mxu0 %v1477_v47  ;;  %633 = vmatpush.msra.mxu2 %v1594_v28  ;;  %v2373_v8 = vld [vmem:[#allocation16_spill] sm:$0xff] }
 0x1a2   :  { %594 = vmatpush.msrb.mxu0 %v1485_v51  ;;  %634 = vmatpush.msra.mxu2 %v1601_v56 }
 0x1a4   :  { %595 = vmatpush.msrb.mxu0 %v1493_v54  ;;  %635 = vmatpush.msra.mxu2 %v1608_v60 }
 0x1a5   :  { %v253_v14 = vpop.f32.mrf.mxu1 }
 0x1a6   :  { %v1830_v29 = vadd.f32 %v1784_v0, %v253_v14  ;;  %596 = vmatpush.msrb.mxu0 %v1499_v58  ;;  %636 = vmatpush.msra.mxu2 %v1615_v2 }
 0x1a8   :  { %2369 = vst [vmem:[#allocation34_spill] sm:$0xff] %v1830_v29  ;;  %597 = vmatpush.msrb.mxu0 %v1506_v61  ;;  %637 = vmatpush.msra.mxu2 %v2370_v19  ;;  %v2376_v29 = vld [vmem:[#allocation18_spill] sm:$0xff] }
 0x1aa   :  { %598 = vmatpush.msrb.mxu0 %v2371_v50  ;;  %638 = vmatpush.msra.mxu2 %v2372_v6 }
 0x1ac   :  { %599 = vmatpush.msrb.mxu0 %v2373_v8  ;;  %639 = vmatpush.msra.mxu2 %v2374_v43 }
 0x1ad   :  { %v256_v21 = vpop.f32.mrf.mxu1 }
 0x1ae   :  { %v1841_v14 = vadd.f32 %v1784_v0, %v256_v21  ;;  %600 = vmatpush.msrb.mxu0 %v2376_v29  ;;  %640 = vmatpush.msra.mxu2 %v2377_v11  ;;  %v245_v21 = vadd.f32 %v1784_v0, %v244_v3 }
 0x1b0   :  { %2375 = vst [vmem:[#allocation23_spill] sm:$0xff] %v1841_v14  ;;  %601 = vmatpush.msrb.mxu0 %v2378_v35  ;;  %641 = vmatpush.msra.mxu2 %v2379_v7  ;;  %v1857_v7 = vld [vmem:[%s2294_s3 + $0x1] ss:$0 sm:$0xff] }
 0x1b5   :  { %v259_v23 = vpop.f32.mrf.mxu1 }
 0x1b6   :  { %v1848_v4 = vadd.f32 %v1784_v0, %v259_v23 }
 0x1b8   :  { %2380 = vst [vmem:[#allocation14_spill] sm:$0xff] %v1848_v4 }
 0x1bd   :  { %v262_v18 = vpop.f32.mrf.mxu1 }
 0x1be   :  { %v1851_v1 = vadd.f32 %v1784_v0, %v262_v18  ;;  %v2398_v0 = vld [vmem:[#allocation33_spill] sm:$0xff] }
 0x1c0   :  { %2381 = vst [vmem:[#allocation25_spill] sm:$0xff] %v1851_v1 }
 0x1de   :  { %v451_v9 = vpop.f32.mrf.mxu1 }
 0x1e4   :  { %v491_v5 = vpop.f32.mrf.mxu3 }
 0x20e   :  { %v431_v62 = vpop.f32.mrf.mxu0 }
 0x20f   :  { %v452_v14 = vadd.f32 %v451_v9, %v431_v62 }
 0x211   :  { %v494_v29 = vadd.f32 %v452_v14, %v245_v21 }
 0x213   :  { %1140 = vtanh.f32 %v494_v29 }
 0x214   :  { %v471_v35 = vpop.f32.mrf.mxu2 }
 0x215   :  { %v492_v23 = vadd.f32 %v491_v5, %v471_v35  ;;  %v2397_v5 = vld [vmem:[#allocation32_spill] sm:$0xff] }
 0x217   :  { %v498_v4 = vadd.f32 %v1857_v7, %v492_v23 }
 0x219   :  { %v1141_v11 = vpop.eup %1140  ;;  %1142 = vtanh.f32 %v498_v4  ;;  %v2395_v4 = vld [vmem:[#allocation30_spill] sm:$0xff] }
 0x21a   :  { %517 = vmatmul.f32.vlgmr.msra.gmra.mxu0 %v1141_v11  ;;  %557 = vmatmul.f32.vlgmr.msrb.gmra.mxu2 %v1141_v11  ;;  %v2396_v11 = vld [vmem:[#allocation21_spill] sm:$0xff] }
 0x21b   :  { %671 = vmatpush.msra.mxu0 %v1431_v31  ;;  %711 = vmatpush.msrb.mxu2 %v1542_v12  ;;  %v2383_v31 = vld [vmem:[#allocation22_spill] sm:$0xff] }
 0x21d   :  { %672 = vmatpush.msra.mxu0 %v1435_v33  ;;  %712 = vmatpush.msrb.mxu2 %v1550_v15  ;;  %v2385_v33 = vld [vmem:[#allocation13_spill] sm:$0xff] }
 0x21f   :  { %v1864_v62 = vpop.eup %1142  ;;  %673 = vmatpush.msra.mxu0 %v1441_v36  ;;  %713 = vmatpush.msrb.mxu2 %v1557_v17  ;;  %v2387_v36 = vld [vmem:[#allocation24_spill] sm:$0xff] }
 0x220   :  { %2382 = vst [vmem:[#allocation16_spill] sm:$0xff] %v1864_v62  ;;  %537 = vmatmul.f32.vlgmr.msra.gmra.mxu1 %v1864_v62  ;;  %577 = vmatmul.f32.vlgmr.msrb.gmra.mxu3 %v1864_v62  ;;  %v1930_v62 = vld [vmem:[#allocation6 + $0xf0] sm:$0xff] }
 0x221   :  { %674 = vmatpush.msra.mxu0 %v1448_v38  ;;  %691 = vmatpush.msra.mxu1 %v1433_v32  ;;  %v2384_v32 = vld [vmem:[#allocation18_spill] sm:$0xff] }
 0x222   :  { %714 = vmatpush.msrb.mxu2 %v1564_v22  ;;  %731 = vmatpush.msrb.mxu3 %v1544_v13 }
 0x223   :  { %675 = vmatpush.msra.mxu0 %v1456_v40  ;;  %692 = vmatpush.msra.mxu1 %v1439_v34  ;;  %v2386_v34 = vld [vmem:[#allocation29_spill] sm:$0xff] }
 0x224   :  { %715 = vmatpush.msrb.mxu2 %v1572_v25  ;;  %732 = vmatpush.msrb.mxu3 %v1554_v16 }
 0x225   :  { %676 = vmatpush.msra.mxu0 %v2367_v10  ;;  %693 = vmatpush.msra.mxu1 %v1443_v37  ;;  %v2388_v37 = vld [vmem:[#allocation20_spill] sm:$0xff] }
 0x226   :  { %716 = vmatpush.msrb.mxu2 %v1579_v30  ;;  %733 = vmatpush.msrb.mxu3 %v1560_v20 }
 0x227   :  { %677 = vmatpush.msra.mxu0 %v1470_v45  ;;  %694 = vmatpush.msra.mxu1 %v1450_v39  ;;  %v2389_v39 = vld [vmem:[#allocation15_spill] sm:$0xff] }
 0x228   :  { %717 = vmatpush.msrb.mxu2 %v1587_v42  ;;  %734 = vmatpush.msrb.mxu3 %v1568_v24 }
 0x229   :  { %678 = vmatpush.msra.mxu0 %v1477_v47  ;;  %695 = vmatpush.msra.mxu1 %v1458_v41  ;;  %v2390_v41 = vld [vmem:[#allocation31_spill] sm:$0xff] }
 0x22a   :  { %718 = vmatpush.msrb.mxu2 %v1594_v28  ;;  %735 = vmatpush.msrb.mxu3 %v1576_v27 }
 0x22b   :  { %679 = vmatpush.msra.mxu0 %v1485_v51  ;;  %696 = vmatpush.msra.mxu1 %v1466_v44  ;;  %v2391_v44 = vld [vmem:[#allocation26_spill] sm:$0xff] }
 0x22c   :  { %719 = vmatpush.msrb.mxu2 %v1601_v56  ;;  %736 = vmatpush.msrb.mxu3 %v1584_v26 }
 0x22d   :  { %680 = vmatpush.msra.mxu0 %v1493_v54  ;;  %697 = vmatpush.msra.mxu1 %v1472_v46  ;;  %v2392_v46 = vld [vmem:[#allocation17_spill] sm:$0xff] }
 0x22e   :  { %720 = vmatpush.msrb.mxu2 %v1608_v60  ;;  %737 = vmatpush.msrb.mxu3 %v1590_v49 }
 0x22f   :  { %681 = vmatpush.msra.mxu0 %v1499_v58  ;;  %698 = vmatpush.msra.mxu1 %v1479_v48  ;;  %v2393_v48 = vld [vmem:[#allocation28_spill] sm:$0xff] }
 0x230   :  { %721 = vmatpush.msrb.mxu2 %v1615_v2  ;;  %738 = vmatpush.msrb.mxu3 %v1597_v53 }
 0x231   :  { %682 = vmatpush.msra.mxu0 %v1506_v61  ;;  %699 = vmatpush.msra.mxu1 %v1487_v52  ;;  %v2394_v52 = vld [vmem:[#allocation19_spill] sm:$0xff] }
 0x232   :  { %722 = vmatpush.msrb.mxu2 %v2370_v19  ;;  %739 = vmatpush.msrb.mxu3 %v1604_v57 }
 0x233   :  { %683 = vmatpush.msra.mxu0 %v2371_v50  ;;  %700 = vmatpush.msra.mxu1 %v1495_v55 }
 0x234   :  { %723 = vmatpush.msrb.mxu2 %v2372_v6  ;;  %740 = vmatpush.msrb.mxu3 %v1611_v63 }
 0x235   :  { %684 = vmatpush.msra.mxu0 %v2373_v8  ;;  %701 = vmatpush.msra.mxu1 %v1501_v59 }
 0x236   :  { %724 = vmatpush.msrb.mxu2 %v2374_v43  ;;  %741 = vmatpush.msrb.mxu3 %v2383_v31 }
 0x237   :  { %685 = vmatpush.msra.mxu0 %v2384_v32  ;;  %702 = vmatpush.msra.mxu1 %v2385_v33 }
 0x238   :  { %725 = vmatpush.msrb.mxu2 %v2386_v34  ;;  %742 = vmatpush.msrb.mxu3 %v2387_v36 }
 0x239   :  { %686 = vmatpush.msra.mxu0 %v2388_v37  ;;  %703 = vmatpush.msra.mxu1 %v2389_v39 }
 0x23a   :  { %726 = vmatpush.msrb.mxu2 %v2390_v41  ;;  %743 = vmatpush.msrb.mxu3 %v2391_v44 }
 0x23b   :  { %704 = vmatpush.msra.mxu1 %v2392_v46 }
 0x23c   :  { %744 = vmatpush.msrb.mxu3 %v2393_v48 }
 0x23d   :  { %705 = vmatpush.msra.mxu1 %v2394_v52 }
 0x23e   :  { %745 = vmatpush.msrb.mxu3 %v2395_v4 }
 0x23f   :  { %706 = vmatpush.msra.mxu1 %v2396_v11 }
 0x240   :  { %746 = vmatpush.msrb.mxu3 %v2397_v5  ;;  %v1934_v5 = vld [vmem:[#allocation6 + $0xe0] sm:$0xff] }
 0x297   :  { %v518_v9 = vpop.f32.mrf.mxu0 }
 0x29d   :  { %v538_v18 = vpop.f32.mrf.mxu1  ;;  %v558_v29 = vpop.f32.mrf.mxu2 }
 0x29e   :  { %v539_v35 = vadd.f32 %v538_v18, %v518_v9  ;;  %v1940_v18 = vld [vmem:[#allocation6 + $0xd0] sm:$0xff] }
 0x2a0   :  { %v581_v3 = vadd.f32 %v539_v35, %v2398_v0  ;;  %v1953_v35 = vld [vmem:[#allocation6 + $0x1e0] sm:$0xff] }
 0x2a2   :  { %1144 = vtanh.f32 %v581_v3 }
 0x2a3   :  { %v578_v14 = vpop.f32.mrf.mxu3 }
 0x2a4   :  { %v579_v21 = vadd.f32 %v578_v14, %v558_v29  ;;  %v2034_v29 = vld [vmem:[#allocation6 + $0xc0] sm:$0xff] }
 0x2a6   :  { %v582_v23 = vadd.f32 %v1857_v7, %v579_v21  ;;  %v2145_v21 = vld [vmem:[#allocation6 + $0xd8] sm:$0xff] }
 0x2a8   :  { %v1145_v1 = vpop.eup %1144  ;;  %1146 = vtanh.f32 %v582_v23  ;;  %v2157_v23 = vld [vmem:[#allocation6 + $0x1f8] sm:$0xff] }
 0x2a9   :  { %602 = vmatmul.f32.vlgmr.msrb.gmra.mxu0 %v1145_v1  ;;  %642 = vmatmul.f32.vlgmr.msra.gmra.mxu2 %v1145_v1  ;;  %v1947_v1 = vld [vmem:[#allocation6 + $0x1f0] sm:$0xff] }
 0x2aa   :  { %756 = vmatpush.msrb.mxu0 %v1930_v62  ;;  %796 = vmatpush.msra.mxu2 %v1542_v12 }
 0x2ac   :  { %757 = vmatpush.msrb.mxu0 %v1934_v5  ;;  %797 = vmatpush.msra.mxu2 %v1550_v15 }
 0x2ae   :  { %v1938_v9 = vpop.eup %1146  ;;  %758 = vmatpush.msrb.mxu0 %v1940_v18  ;;  %798 = vmatpush.msra.mxu2 %v1557_v17 }
 0x2af   :  { %622 = vmatmul.f32.vlgmr.msrb.gmra.mxu1 %v1938_v9  ;;  %662 = vmatmul.f32.vlgmr.msra.gmra.mxu3 %v1938_v9 }
 0x2b0   :  { %759 = vmatpush.msrb.mxu0 %v1448_v38  ;;  %776 = vmatpush.msrb.mxu1 %v1947_v1  ;;  %v1959_v38 = vld [vmem:[#allocation6 + $0x1d0] sm:$0xff] }
 0x2b1   :  { %799 = vmatpush.msra.mxu2 %v1564_v22  ;;  %816 = vmatpush.msra.mxu3 %v1544_v13 }
 0x2b2   :  { %760 = vmatpush.msrb.mxu0 %v1456_v40  ;;  %777 = vmatpush.msrb.mxu1 %v1953_v35  ;;  %v1965_v40 = vld [vmem:[#allocation6 + $0x1c0] sm:$0xff] }
 0x2b3   :  { %800 = vmatpush.msra.mxu2 %v1572_v25  ;;  %817 = vmatpush.msra.mxu3 %v1554_v16 }
 0x2b4   :  { %761 = vmatpush.msrb.mxu0 %v2367_v10  ;;  %778 = vmatpush.msrb.mxu1 %v1959_v38  ;;  %v1971_v10 = vld [vmem:[#allocation6 + $0x1b0] sm:$0xff] }
 0x2b5   :  { %801 = vmatpush.msra.mxu2 %v1579_v30  ;;  %818 = vmatpush.msra.mxu3 %v1560_v20 }
 0x2b6   :  { %762 = vmatpush.msrb.mxu0 %v1470_v45  ;;  %779 = vmatpush.msrb.mxu1 %v1965_v40  ;;  %v1977_v45 = vld [vmem:[#allocation6 + $0x1a0] sm:$0xff] }
 0x2b7   :  { %802 = vmatpush.msra.mxu2 %v1587_v42  ;;  %819 = vmatpush.msra.mxu3 %v1568_v24 }
 0x2b8   :  { %763 = vmatpush.msrb.mxu0 %v1477_v47  ;;  %780 = vmatpush.msrb.mxu1 %v1971_v10  ;;  %v1983_v47 = vld [vmem:[#allocation6 + $0x190] sm:$0xff] }
 0x2b9   :  { %803 = vmatpush.msra.mxu2 %v1594_v28  ;;  %820 = vmatpush.msra.mxu3 %v1576_v27 }
 0x2ba   :  { %764 = vmatpush.msrb.mxu0 %v1485_v51  ;;  %781 = vmatpush.msrb.mxu1 %v1977_v45  ;;  %v1989_v51 = vld [vmem:[#allocation6 + $0x180] sm:$0xff] }
 0x2bb   :  { %804 = vmatpush.msra.mxu2 %v1601_v56  ;;  %821 = vmatpush.msra.mxu3 %v1584_v26 }
 0x2bc   :  { %765 = vmatpush.msrb.mxu0 %v1493_v54  ;;  %782 = vmatpush.msrb.mxu1 %v1983_v47  ;;  %v1995_v54 = vld [vmem:[#allocation6 + $0x170] sm:$0xff] }
 0x2bd   :  { %805 = vmatpush.msra.mxu2 %v1608_v60  ;;  %822 = vmatpush.msra.mxu3 %v1590_v49 }
 0x2be   :  { %766 = vmatpush.msrb.mxu0 %v1499_v58  ;;  %783 = vmatpush.msrb.mxu1 %v1989_v51 }
 0x2bf   :  { %806 = vmatpush.msra.mxu2 %v1615_v2  ;;  %823 = vmatpush.msra.mxu3 %v1597_v53 }
 0x2c0   :  { %767 = vmatpush.msrb.mxu0 %v1506_v61  ;;  %784 = vmatpush.msrb.mxu1 %v1995_v54 }
 0x2c1   :  { %807 = vmatpush.msra.mxu2 %v2370_v19  ;;  %824 = vmatpush.msra.mxu3 %v1604_v57 }
 0x2c2   :  { %768 = vmatpush.msrb.mxu0 %v2371_v50  ;;  %785 = vmatpush.msrb.mxu1 %v1495_v55  ;;  %v2399_v55 = vld [vmem:[#allocation32_spill] sm:$0xff] }
 0x2c3   :  { %808 = vmatpush.msra.mxu2 %v2372_v6  ;;  %825 = vmatpush.msra.mxu3 %v1611_v63 }
 0x2c4   :  { %769 = vmatpush.msrb.mxu0 %v2373_v8  ;;  %786 = vmatpush.msrb.mxu1 %v1501_v59  ;;  %v2400_v8 = vld [vmem:[#allocation12_spill] sm:$0xff] }
 0x2c5   :  { %809 = vmatpush.msra.mxu2 %v2374_v43  ;;  %826 = vmatpush.msra.mxu3 %v2383_v31 }
 0x2c6   :  { %770 = vmatpush.msrb.mxu0 %v2384_v32  ;;  %787 = vmatpush.msrb.mxu1 %v2385_v33 }
 0x2c7   :  { %810 = vmatpush.msra.mxu2 %v2386_v34  ;;  %827 = vmatpush.msra.mxu3 %v2387_v36 }
 0x2c8   :  { %771 = vmatpush.msrb.mxu0 %v2388_v37  ;;  %788 = vmatpush.msrb.mxu1 %v2389_v39 }
 0x2c9   :  { %811 = vmatpush.msra.mxu2 %v2390_v41  ;;  %828 = vmatpush.msra.mxu3 %v2391_v44 }
 0x2ca   :  { %789 = vmatpush.msrb.mxu1 %v2392_v46 }
 0x2cb   :  { %829 = vmatpush.msra.mxu3 %v2393_v48 }
 0x2cc   :  { %790 = vmatpush.msrb.mxu1 %v2394_v52  ;;  %v2401_v52 = vld [vmem:[#allocation16_spill] sm:$0xff] }
 0x2cd   :  { %830 = vmatpush.msra.mxu3 %v2395_v4 }
 0x2ce   :  { %791 = vmatpush.msrb.mxu1 %v2396_v11  ;;  %v585_v11 = vmax.f32 %v2401_v52, %v1938_v9  ;;  %v2162_v9 = vld [vmem:[#allocation6 + $0xb8] sm:$0xff]  ;;  %v1229_v52 = vld [vmem:[#allocation6 + $0x8] sm:$0xff] }
 0x2cf   :  { %831 = vmatpush.msra.mxu3 %v2399_v55 }
 0x326   :  { %v603_v58 = vpop.f32.mrf.mxu0 }
 0x32c   :  { %v623_v59 = vpop.f32.mrf.mxu1  ;;  %v643_v32 = vpop.f32.mrf.mxu2 }
 0x32d   :  { %v624_v61 = vadd.f32 %v623_v59, %v603_v58  ;;  %v2181_v58 = vld [vmem:[#allocation6 + $0x1c8] sm:$0xff]  ;;  %v2189_v59 = vld [vmem:[#allocation6 + $0x1b8] sm:$0xff] }
 0x32f   :  { %v666_v50 = vadd.f32 %v624_v61, %v2400_v8  ;;  %v2197_v61 = vld [vmem:[#allocation6 + $0x1a8] sm:$0xff]  ;;  %v2205_v8 = vld [vmem:[#allocation6 + $0x198] sm:$0xff] }
 0x331   :  { %1148 = vtanh.f32 %v666_v50  ;;  %v2213_v50 = vld [vmem:[#allocation6 + $0x188] sm:$0xff] }
 0x332   :  { %v663_v33 = vpop.f32.mrf.mxu3 }
 0x333   :  { %v664_v37 = vadd.f32 %v663_v33, %v643_v32  ;;  %v2221_v32 = vld [vmem:[#allocation6 + $0x178] sm:$0xff]  ;;  %v2229_v33 = vld [vmem:[#allocation6 + $0x168] sm:$0xff] }
 0x335   :  { %v667_v39 = vadd.f32 %v1857_v7, %v664_v37  ;;  %v2237_v37 = vld [vmem:[#allocation6 + $0x158] sm:$0xff] }
 0x337   :  { %v1149_v46 = vpop.eup %1148  ;;  %1150 = vtanh.f32 %v667_v39  ;;  %v1227_v39 = vld [vmem:[#allocation6 + $0x18] sm:$0xff] }
 0x338   :  { %687 = vmatmul.f32.vlgmr.msra.gmra.mxu0 %v1149_v46  ;;  %727 = vmatmul.f32.vlgmr.msrb.gmra.mxu2 %v1149_v46  ;;  %v1228_v46 = vld [vmem:[#allocation6 + $0x148] sm:$0xff] }
 0x339   :  { %841 = vmatpush.msra.mxu0 %v1930_v62  ;;  %881 = vmatpush.msrb.mxu2 %v1542_v12  ;;  %v2040_v12 = vld [vmem:[#allocation6 + $0xb0] sm:$0xff] }
 0x33b   :  { %842 = vmatpush.msra.mxu0 %v1934_v5  ;;  %882 = vmatpush.msrb.mxu2 %v1550_v15  ;;  %v2046_v15 = vld [vmem:[#allocation6 + $0xa0] sm:$0xff] }
 0x33d   :  { %v1151_v0 = vpop.eup %1150  ;;  %843 = vmatpush.msra.mxu0 %v1940_v18  ;;  %883 = vmatpush.msrb.mxu2 %v1557_v17  ;;  %v2064_v17 = vld [vmem:[#allocation6 + $0x70] sm:$0xff] }
 0x33e   :  { %707 = vmatmul.f32.vlgmr.msra.gmra.mxu1 %v1151_v0  ;;  %747 = vmatmul.f32.vlgmr.msrb.gmra.mxu3 %v1151_v0  ;;  %v2032_v3 = vmax.f32 %v585_v11, %v1151_v0  ;;  %v1230_v11 = vld [vmem:[#allocation6 + $0x138] sm:$0xff]  ;;  %v1231_v0 = vld [vmem:[#allocation6 + $0x128] sm:$0xff] }
 0x33f   :  { %844 = vmatpush.msra.mxu0 %v2034_v29  ;;  %861 = vmatpush.msra.mxu1 %v1947_v1 }
 0x340   :  { %884 = vmatpush.msrb.mxu2 %v1564_v22  ;;  %901 = vmatpush.msrb.mxu3 %v1544_v13  ;;  %v2052_v13 = vld [vmem:[#allocation6 + $0x90] sm:$0xff] }
 0x341   :  { %845 = vmatpush.msra.mxu0 %v2040_v12  ;;  %862 = vmatpush.msra.mxu1 %v1953_v35  ;;  %v2076_v22 = vld [vmem:[#allocation6 + $0x50] sm:$0xff] }
 0x342   :  { %885 = vmatpush.msrb.mxu2 %v1572_v25  ;;  %902 = vmatpush.msrb.mxu3 %v1554_v16  ;;  %v2058_v16 = vld [vmem:[#allocation6 + $0x80] sm:$0xff]  ;;  %v2088_v25 = vld [vmem:[#allocation6 + $0x30] sm:$0xff] }
 0x343   :  { %846 = vmatpush.msra.mxu0 %v2046_v15  ;;  %863 = vmatpush.msra.mxu1 %v1959_v38 }
 0x344   :  { %886 = vmatpush.msrb.mxu2 %v1579_v30  ;;  %903 = vmatpush.msrb.mxu3 %v1560_v20  ;;  %v2070_v20 = vld [vmem:[#allocation6 + $0x60] sm:$0xff] }
 0x345   :  { %847 = vmatpush.msra.mxu0 %v2052_v13  ;;  %864 = vmatpush.msra.mxu1 %v1965_v40  ;;  %v2096_v30 = vld [vmem:[#allocation6 + $0x20] sm:$0xff] }
 0x346   :  { %887 = vmatpush.msrb.mxu2 %v1587_v42  ;;  %904 = vmatpush.msrb.mxu3 %v1568_v24  ;;  %v2082_v24 = vld [vmem:[#allocation6 + $0x40] sm:$0xff]  ;;  %v2104_v42 = vld [vmem:[#allocation6 + $0x10] sm:$0xff] }
 0x347   :  { %848 = vmatpush.msra.mxu0 %v2058_v16  ;;  %865 = vmatpush.msra.mxu1 %v1971_v10 }
 0x348   :  { %888 = vmatpush.msrb.mxu2 %v1594_v28  ;;  %905 = vmatpush.msrb.mxu3 %v1576_v27  ;;  %v2091_v27 = vld [vmem:[#allocation6 + $0x160] sm:$0xff] }
 0x349   :  { %849 = vmatpush.msra.mxu0 %v2064_v17  ;;  %866 = vmatpush.msra.mxu1 %v1977_v45  ;;  %v2112_v28 = vld [vmem:[#allocation6] sm:$0xff] }
 0x34a   :  { %889 = vmatpush.msrb.mxu2 %v1601_v56  ;;  %906 = vmatpush.msrb.mxu3 %v1584_v26  ;;  %v2099_v26 = vld [vmem:[#allocation6 + $0x150] sm:$0xff]  ;;  %v2120_v56 = vld [vmem:[#allocation6 + $0x120] sm:$0xff] }
 0x34b   :  { %850 = vmatpush.msra.mxu0 %v2070_v20  ;;  %867 = vmatpush.msra.mxu1 %v1983_v47 }
 0x34c   :  { %890 = vmatpush.msrb.mxu2 %v1608_v60  ;;  %907 = vmatpush.msrb.mxu3 %v1590_v49  ;;  %v2107_v49 = vld [vmem:[#allocation6 + $0x140] sm:$0xff] }
 0x34d   :  { %851 = vmatpush.msra.mxu0 %v2076_v22  ;;  %868 = vmatpush.msra.mxu1 %v1989_v51  ;;  %v2128_v60 = vld [vmem:[#allocation6 + $0x100] sm:$0xff] }
 0x34e   :  { %891 = vmatpush.msrb.mxu2 %v1615_v2  ;;  %908 = vmatpush.msrb.mxu3 %v1597_v53  ;;  %v2115_v53 = vld [vmem:[#allocation6 + $0x130] sm:$0xff] }
 0x34f   :  { %852 = vmatpush.msra.mxu0 %v2082_v24  ;;  %869 = vmatpush.msra.mxu1 %v1995_v54 }
 0x350   :  { %892 = vmatpush.msrb.mxu2 %v2370_v19  ;;  %909 = vmatpush.msrb.mxu3 %v1604_v57  ;;  %v2124_v57 = vld [vmem:[#allocation6 + $0x110] sm:$0xff] }
 0x351   :  { %853 = vmatpush.msra.mxu0 %v2088_v25  ;;  %870 = vmatpush.msra.mxu1 %v2091_v27  ;;  %v2402_v19 = vld [vmem:[#allocation34_spill] sm:$0xff] }
 0x352   :  { %893 = vmatpush.msrb.mxu2 %v2372_v6  ;;  %910 = vmatpush.msrb.mxu3 %v1611_v63 }
 0x353   :  { %854 = vmatpush.msra.mxu0 %v2096_v30  ;;  %871 = vmatpush.msra.mxu1 %v2099_v26 }
 0x354   :  { %894 = vmatpush.msrb.mxu2 %v2374_v43  ;;  %911 = vmatpush.msrb.mxu3 %v2383_v31 }
 0x355   :  { %855 = vmatpush.msra.mxu0 %v2104_v42  ;;  %872 = vmatpush.msra.mxu1 %v2107_v49 }
 0x356   :  { %895 = vmatpush.msrb.mxu2 %v2386_v34  ;;  %912 = vmatpush.msrb.mxu3 %v2387_v36 }
 0x357   :  { %856 = vmatpush.msra.mxu0 %v2112_v28  ;;  %873 = vmatpush.msra.mxu1 %v2115_v53 }
 0x358   :  { %896 = vmatpush.msrb.mxu2 %v2390_v41  ;;  %913 = vmatpush.msrb.mxu3 %v2391_v44 }
 0x359   :  { %874 = vmatpush.msra.mxu1 %v2120_v56 }
 0x35a   :  { %914 = vmatpush.msrb.mxu3 %v2393_v48  ;;  %v2135_v48 = vld [vmem:[#allocation6 + $0xf8] sm:$0xff] }
 0x35b   :  { %875 = vmatpush.msra.mxu1 %v2124_v57 }
 0x35c   :  { %915 = vmatpush.msrb.mxu3 %v2395_v4  ;;  %v2139_v4 = vld [vmem:[#allocation6 + $0xe8] sm:$0xff] }
 0x35d   :  { %876 = vmatpush.msra.mxu1 %v2128_v60 }
 0x35e   :  { %916 = vmatpush.msrb.mxu3 %v2399_v55  ;;  %v2173_v55 = vld [vmem:[#allocation6 + $0x1d8] sm:$0xff] }
 0x3b5   :  { %v688_v63 = vpop.f32.mrf.mxu0 }
 0x3bb   :  { %v708_v2 = vpop.f32.mrf.mxu1  ;;  %v728_v31 = vpop.f32.mrf.mxu2 }
 0x3bc   :  { %v709_v43 = vadd.f32 %v708_v2, %v688_v63 }
 0x3be   :  { %v751_v6 = vadd.f32 %v709_v43, %v2402_v19 }
 0x3c0   :  { %1152 = vtanh.f32 %v751_v6 }
 0x3c1   :  { %v748_v34 = vpop.f32.mrf.mxu3 }
 0x3c2   :  { %v749_v36 = vadd.f32 %v748_v34, %v728_v31  ;;  %v1069_v31 = vld [vmem:[#allocation7 + $0x78] sm:$0xff]  ;;  %v1068_v34 = vld [vmem:[#allocation7 + $0x70] sm:$0xff] }
 0x3c4   :  { %v752_v41 = vadd.f32 %v1857_v7, %v749_v36  ;;  %v1067_v36 = vld [vmem:[#allocation7 + $0x68] sm:$0xff] }
 0x3c6   :  { %v1153_v44 = vpop.eup %1152  ;;  %1154 = vtanh.f32 %v752_v41  ;;  %v1066_v41 = vld [vmem:[#allocation7 + $0x60] sm:$0xff] }
 0x3c7   :  { %772 = vmatmul.f32.vlgmr.msrb.gmra.mxu0 %v1153_v44  ;;  %812 = vmatmul.f32.vlgmr.msra.gmra.mxu2 %v1153_v44  ;;  %v1065_v44 = vld [vmem:[#allocation7 + $0x58] sm:$0xff] }
 0x3c8   :  { %926 = vmatpush.msrb.mxu0 %v1930_v62  ;;  %966 = vmatpush.msra.mxu2 %v2135_v48 }
 0x3ca   :  { %927 = vmatpush.msrb.mxu0 %v1934_v5  ;;  %967 = vmatpush.msra.mxu2 %v2139_v4  ;;  %v2154_v5 = vld [vmem:[#allocation6 + $0xc8] sm:$0xff] }
 0x3cc   :  { %v2142_v14 = vpop.eup %1154  ;;  %928 = vmatpush.msrb.mxu0 %v1940_v18  ;;  %968 = vmatpush.msra.mxu2 %v2145_v21  ;;  %v2165_v18 = vld [vmem:[#allocation6 + $0x1e8] sm:$0xff] }
 0x3cd   :  { %792 = vmatmul.f32.vlgmr.msrb.gmra.mxu1 %v2142_v14  ;;  %832 = vmatmul.f32.vlgmr.msra.gmra.mxu3 %v2142_v14  ;;  %v755_v62 = vmax.f32 %v2032_v3, %v2142_v14 }
 0x3ce   :  { %929 = vmatpush.msrb.mxu0 %v2034_v29  ;;  %946 = vmatpush.msrb.mxu1 %v1947_v1  ;;  %v2170_v1 = vld [vmem:[#allocation6 + $0xa8] sm:$0xff]  ;;  %v1232_v29 = vld [vmem:[#allocation6 + $0x118] sm:$0xff] }
 0x3cf   :  { %969 = vmatpush.msra.mxu2 %v2154_v5  ;;  %986 = vmatpush.msra.mxu3 %v2157_v23 }
 0x3d0   :  { %930 = vmatpush.msrb.mxu0 %v2040_v12  ;;  %947 = vmatpush.msrb.mxu1 %v1953_v35  ;;  %v2178_v35 = vld [vmem:[#allocation6 + $0x98] sm:$0xff]  ;;  %v1233_v12 = vld [vmem:[#allocation6 + $0x108] sm:$0xff] }
 0x3d1   :  { %970 = vmatpush.msra.mxu2 %v2162_v9  ;;  %987 = vmatpush.msra.mxu3 %v2165_v18 }
 0x3d2   :  { %931 = vmatpush.msrb.mxu0 %v2046_v15  ;;  %948 = vmatpush.msrb.mxu1 %v1959_v38  ;;  %v2186_v38 = vld [vmem:[#allocation6 + $0x88] sm:$0xff] }
 0x3d3   :  { %971 = vmatpush.msra.mxu2 %v2170_v1  ;;  %988 = vmatpush.msra.mxu3 %v2173_v55 }
 0x3d4   :  { %932 = vmatpush.msrb.mxu0 %v2052_v13  ;;  %949 = vmatpush.msrb.mxu1 %v1965_v40  ;;  %v2194_v40 = vld [vmem:[#allocation6 + $0x78] sm:$0xff] }
 0x3d5   :  { %972 = vmatpush.msra.mxu2 %v2178_v35  ;;  %989 = vmatpush.msra.mxu3 %v2181_v58 }
 0x3d6   :  { %933 = vmatpush.msrb.mxu0 %v2058_v16  ;;  %950 = vmatpush.msrb.mxu1 %v1971_v10  ;;  %v2202_v10 = vld [vmem:[#allocation6 + $0x68] sm:$0xff] }
 0x3d7   :  { %973 = vmatpush.msra.mxu2 %v2186_v38  ;;  %990 = vmatpush.msra.mxu3 %v2189_v59 }
 0x3d8   :  { %934 = vmatpush.msrb.mxu0 %v2064_v17  ;;  %951 = vmatpush.msrb.mxu1 %v1977_v45  ;;  %v2210_v45 = vld [vmem:[#allocation6 + $0x58] sm:$0xff] }
 0x3d9   :  { %974 = vmatpush.msra.mxu2 %v2194_v40  ;;  %991 = vmatpush.msra.mxu3 %v2197_v61  ;;  %v2403_v17 = vld [vmem:[#allocation23_spill] sm:$0xff] }
 0x3da   :  { %935 = vmatpush.msrb.mxu0 %v2070_v20  ;;  %952 = vmatpush.msrb.mxu1 %v1983_v47  ;;  %v2218_v47 = vld [vmem:[#allocation6 + $0x48] sm:$0xff] }
 0x3db   :  { %975 = vmatpush.msra.mxu2 %v2202_v10  ;;  %992 = vmatpush.msra.mxu3 %v2205_v8 }
 0x3dc   :  { %936 = vmatpush.msrb.mxu0 %v2076_v22  ;;  %953 = vmatpush.msrb.mxu1 %v1989_v51  ;;  %v2226_v51 = vld [vmem:[#allocation6 + $0x38] sm:$0xff] }
 0x3dd   :  { %976 = vmatpush.msra.mxu2 %v2210_v45  ;;  %993 = vmatpush.msra.mxu3 %v2213_v50 }
 0x3de   :  { %937 = vmatpush.msrb.mxu0 %v2082_v24  ;;  %954 = vmatpush.msrb.mxu1 %v1995_v54  ;;  %v2234_v54 = vld [vmem:[#allocation6 + $0x28] sm:$0xff] }
 0x3df   :  { %977 = vmatpush.msra.mxu2 %v2218_v47  ;;  %994 = vmatpush.msra.mxu3 %v2221_v32 }
 0x3e0   :  { %938 = vmatpush.msrb.mxu0 %v2088_v25  ;;  %955 = vmatpush.msrb.mxu1 %v2091_v27 }
 0x3e1   :  { %978 = vmatpush.msra.mxu2 %v2226_v51  ;;  %995 = vmatpush.msra.mxu3 %v2229_v33 }
 0x3e2   :  { %939 = vmatpush.msrb.mxu0 %v2096_v30  ;;  %956 = vmatpush.msrb.mxu1 %v2099_v26 }
 0x3e3   :  { %979 = vmatpush.msra.mxu2 %v2234_v54  ;;  %996 = vmatpush.msra.mxu3 %v2237_v37 }
 0x3e4   :  { %940 = vmatpush.msrb.mxu0 %v2104_v42  ;;  %957 = vmatpush.msrb.mxu1 %v2107_v49 }
 0x3e5   :  { %980 = vmatpush.msra.mxu2 %v1227_v39  ;;  %997 = vmatpush.msra.mxu3 %v1228_v46 }
 0x3e6   :  { %941 = vmatpush.msrb.mxu0 %v2112_v28  ;;  %958 = vmatpush.msrb.mxu1 %v2115_v53  ;;  %v2404_v53 = vld [vmem:[#allocation14_spill] sm:$0xff] }
 0x3e7   :  { %981 = vmatpush.msra.mxu2 %v1229_v52  ;;  %998 = vmatpush.msra.mxu3 %v1230_v11 }
 0x3e8   :  { %959 = vmatpush.msrb.mxu1 %v2120_v56 }
 0x3e9   :  { %999 = vmatpush.msra.mxu3 %v1231_v0 }
 0x3ea   :  { %960 = vmatpush.msrb.mxu1 %v2124_v57 }
 0x3eb   :  { %1000 = vmatpush.msra.mxu3 %v1232_v29 }
 0x3ec   :  { %961 = vmatpush.msrb.mxu1 %v2128_v60 }
 0x3ed   :  { %1001 = vmatpush.msra.mxu3 %v1233_v12 }
 0x444   :  { %v773_v15 = vpop.f32.mrf.mxu0 }
 0x44a   :  { %v793_v13 = vpop.f32.mrf.mxu1  ;;  %v813_v22 = vpop.f32.mrf.mxu2 }
 0x44b   :  { %v794_v16 = vadd.f32 %v793_v13, %v773_v15 }
 0x44d   :  { %v836_v20 = vadd.f32 %v794_v16, %v2403_v17 }
 0x44f   :  { %1156 = vtanh.f32 %v836_v20 }
 0x450   :  { %v833_v24 = vpop.f32.mrf.mxu3 }
 0x451   :  { %v834_v25 = vadd.f32 %v833_v24, %v813_v22 }
 0x453   :  { %v837_v27 = vadd.f32 %v1857_v7, %v834_v25 }
 0x455   :  { %v1157_v30 = vpop.eup %1156  ;;  %1158 = vtanh.f32 %v837_v27 }
 0x456   :  { %857 = vmatmul.f32.vlgmr.msra.gmra.mxu0 %v1157_v30  ;;  %897 = vmatmul.f32.vlgmr.msrb.gmra.mxu2 %v1157_v30 }
 0x457   :  { %1011 = vmatpush.msra.mxu0 %v2135_v48  ;;  %1074 = vmatpush.msrb.mxu2 %v1069_v31  ;;  %v1064_v48 = vld [vmem:[#allocation7 + $0x50] sm:$0xff] }
 0x459   :  { %1012 = vmatpush.msra.mxu0 %v2139_v4  ;;  %1075 = vmatpush.msrb.mxu2 %v1068_v34 }
 0x45b   :  { %v1159_v26 = vpop.eup %1158  ;;  %1013 = vmatpush.msra.mxu0 %v2145_v21  ;;  %1076 = vmatpush.msrb.mxu2 %v1067_v36 }
 0x45c   :  { %877 = vmatmul.f32.vlgmr.msra.gmra.mxu1 %v1159_v26  ;;  %917 = vmatmul.f32.vlgmr.msrb.gmra.mxu3 %v1159_v26  ;;  %v2255_v42 = vmax.f32 %v755_v62, %v1159_v26  ;;  %v2405_v62 = vld [vmem:[#allocation25_spill] sm:$0xff] }
 0x45d   :  { %1014 = vmatpush.msra.mxu0 %v2154_v5  ;;  %1031 = vmatpush.msra.mxu1 %v2157_v23 }
 0x45e   :  { %1077 = vmatpush.msrb.mxu2 %v1066_v41 }
 0x45f   :  { %1015 = vmatpush.msra.mxu0 %v2162_v9  ;;  %1032 = vmatpush.msra.mxu1 %v2165_v18 }
 0x460   :  { %1078 = vmatpush.msrb.mxu2 %v1065_v44 }
 0x461   :  { %1016 = vmatpush.msra.mxu0 %v2170_v1  ;;  %1033 = vmatpush.msra.mxu1 %v2173_v55 }
 0x462   :  { %1079 = vmatpush.msrb.mxu2 %v1064_v48 }
 0x463   :  { %1017 = vmatpush.msra.mxu0 %v2178_v35  ;;  %1034 = vmatpush.msra.mxu1 %v2181_v58 }
 0x465   :  { %1018 = vmatpush.msra.mxu0 %v2186_v38  ;;  %1035 = vmatpush.msra.mxu1 %v2189_v59  ;;  %v1063_v38 = vld [vmem:[#allocation7 + $0x48] sm:$0xff]  ;;  %v1062_v59 = vld [vmem:[#allocation7 + $0x40] sm:$0xff] }
 0x466   :  { %1080 = vmatpush.msrb.mxu2 %v1063_v38 }
 0x467   :  { %1019 = vmatpush.msra.mxu0 %v2194_v40  ;;  %1036 = vmatpush.msra.mxu1 %v2197_v61  ;;  %v1061_v40 = vld [vmem:[#allocation7 + $0x38] sm:$0xff]  ;;  %v1060_v61 = vld [vmem:[#allocation7 + $0x30] sm:$0xff] }
 0x468   :  { %1081 = vmatpush.msrb.mxu2 %v1062_v59 }
 0x469   :  { %1020 = vmatpush.msra.mxu0 %v2202_v10  ;;  %1037 = vmatpush.msra.mxu1 %v2205_v8  ;;  %v1059_v10 = vld [vmem:[#allocation7 + $0x28] sm:$0xff]  ;;  %v1058_v8 = vld [vmem:[#allocation7 + $0x20] sm:$0xff] }
 0x46a   :  { %1082 = vmatpush.msrb.mxu2 %v1061_v40 }
 0x46b   :  { %1021 = vmatpush.msra.mxu0 %v2210_v45  ;;  %1038 = vmatpush.msra.mxu1 %v2213_v50  ;;  %v1057_v45 = vld [vmem:[#allocation7 + $0x18] sm:$0xff]  ;;  %v1056_v50 = vld [vmem:[#allocation7 + $0x10] sm:$0xff] }
 0x46c   :  { %1083 = vmatpush.msrb.mxu2 %v1060_v61 }
 0x46d   :  { %1022 = vmatpush.msra.mxu0 %v2218_v47  ;;  %1039 = vmatpush.msra.mxu1 %v2221_v32  ;;  %v1055_v47 = vld [vmem:[#allocation7 + $0x8] sm:$0xff]  ;;  %v1054_v32 = vld [vmem:[#allocation7] sm:$0xff] }
 0x46e   :  { %1084 = vmatpush.msrb.mxu2 %v1059_v10 }
 0x46f   :  { %1023 = vmatpush.msra.mxu0 %v2226_v51  ;;  %1040 = vmatpush.msra.mxu1 %v2229_v33 }
 0x470   :  { %1085 = vmatpush.msrb.mxu2 %v1058_v8 }
 0x471   :  { %1024 = vmatpush.msra.mxu0 %v2234_v54  ;;  %1041 = vmatpush.msra.mxu1 %v2237_v37 }
 0x472   :  { %1086 = vmatpush.msrb.mxu2 %v1057_v45 }
 0x473   :  { %1025 = vmatpush.msra.mxu0 %v1227_v39  ;;  %1042 = vmatpush.msra.mxu1 %v1228_v46 }
 0x474   :  { %1087 = vmatpush.msrb.mxu2 %v1056_v50 }
 0x475   :  { %1026 = vmatpush.msra.mxu0 %v1229_v52  ;;  %1043 = vmatpush.msra.mxu1 %v1230_v11  ;;  %v1135_v52 = vld [vmem:[%s2297_s6] ss:$0 sm:$0xff] }
 0x476   :  { %1088 = vmatpush.msrb.mxu2 %v1055_v47 }
 0x477   :  { %1044 = vmatpush.msra.mxu1 %v1231_v0 }
 0x478   :  { %1089 = vmatpush.msrb.mxu2 %v1054_v32 }
 0x479   :  { %1045 = vmatpush.msra.mxu1 %v1232_v29 }
 0x47b   :  { %1046 = vmatpush.msra.mxu1 %v1233_v12 }
 0x4d3   :  { %v858_v3 = vpop.f32.mrf.mxu0 }
 0x4d9   :  { %v878_v49 = vpop.f32.mrf.mxu1  ;;  %v898_v57 = vpop.f32.mrf.mxu2 }
 0x4da   :  { %v879_v28 = vadd.f32 %v878_v49, %v858_v3 }
 0x4dc   :  { %v921_v56 = vadd.f32 %v879_v28, %v2404_v53 }
 0x4de   :  { %1160 = vtanh.f32 %v921_v56 }
 0x4df   :  { %v918_v60 = vpop.f32.mrf.mxu3 }
 0x4e0   :  { %v919_v63 = vadd.f32 %v918_v60, %v898_v57 }
 0x4e2   :  { %v922_v2 = vadd.f32 %v1857_v7, %v919_v63 }
 0x4e4   :  { %v1161_v43 = vpop.eup %1160  ;;  %1162 = vtanh.f32 %v922_v2 }
 0x4e5   :  { %942 = vmatmul.f32.vlgmr.msrb.gmra.mxu0 %v1161_v43  ;;  %982 = vmatmul.f32.vlgmr.msra.gmra.mxu2 %v1161_v43 }
 0x4ea   :  { %v1163_v19 = vpop.eup %1162 }
 0x4eb   :  { %962 = vmatmul.f32.vlgmr.msrb.gmra.mxu1 %v1163_v19  ;;  %1002 = vmatmul.f32.vlgmr.msra.gmra.mxu3 %v1163_v19  ;;  %v925_v6 = vmax.f32 %v2255_v42, %v1163_v19 }
 0x562   :  { %v943_v4 = vpop.f32.mrf.mxu0 }
 0x568   :  { %v963_v14 = vpop.f32.mrf.mxu1  ;;  %v983_v23 = vpop.f32.mrf.mxu2 }
 0x569   :  { %v964_v21 = vadd.f32 %v963_v14, %v943_v4 }
 0x56b   :  { %v1006_v5 = vadd.f32 %v964_v21, %v2405_v62 }
 0x56d   :  { %1164 = vtanh.f32 %v1006_v5 }
 0x56e   :  { %v1003_v9 = vpop.f32.mrf.mxu3 }
 0x56f   :  { %v1004_v18 = vadd.f32 %v1003_v9, %v983_v23 }
 0x571   :  { %v1007_v1 = vadd.f32 %v1857_v7, %v1004_v18 }
 0x573   :  { %v1165_v55 = vpop.eup %1164  ;;  %1166 = vtanh.f32 %v1007_v1 }
 0x574   :  { %1027 = vmatmul.f32.vlgmr.msra.gmra.mxu0 %v1165_v55 }
 0x579   :  { %v1167_v35 = vpop.eup %1166 }
 0x57a   :  { %1047 = vmatmul.f32.vlgmr.msra.gmra.mxu1 %v1167_v35  ;;  %v1010_v58 = vmax.f32 %v925_v6, %v1167_v35 }
 0x5f1   :  { %v1028_v51 = vpop.f32.mrf.mxu0 }
 0x5f7   :  { %v1048_v33 = vpop.f32.mrf.mxu1 }
 0x5f8   :  { %v1049_v54 = vadd.f32 %v1048_v33, %v1028_v51 }
 0x5fa   :  { %v1051_v37 = vadd.f32 %v1857_v7, %v1049_v54 }
 0x5fc   :  { %1168 = vtanh.f32 %v1051_v37 }
 0x602   :  { %v1169_v39 = vpop.eup %1168 }
 0x603   :  { %v1053_v46 = vmax.f32 %v1010_v58, %v1169_v39 }
 0x605   :  { %1090 = vmatmul.f32.vlgmr.msrb.gmra.mxu2 %v1053_v46 }
 0x688   :  { %v1091_v11 = vpop.f32.mrf.mxu2 }
 0x689   :  { %v1092_v0 = vadd.f32 %v1135_v52, %v1091_v11 }
 0x68b   :  { %1094 = vst [vmem:[%s2298_s7] sm:$0xff] %v1092_v0 }
 0x68c   :  { %1099 = vsyncpa [#allocation3], 1 }
 0x68d   :  { %1100 = vsyncpa [#allocation5], 1 }
 0x68e   :  { %1101 = vsyncpa [#allocation8], 1 }

</bundles_post_ra>
